<compile_context>
chip_gen: v7x
topology: tpu7x:2x2x1
jax: 0.10.0
libtpu: 0.0.40
codegen_flags: <defaults>
</compile_context>

<pallas_src>
import functools
import math

import jax
import jax.numpy as jnp
from jax.experimental import pallas as pl
from jax.experimental.pallas import tpu as pltpu


def _round_up(x, m):
    return (x + m - 1) // m * m


def _device_kind():
    try:
        return jax.devices()[0].device_kind.lower()
    except Exception:
        return ""


_KIND = _device_kind()
_IS_V5E = ("v5 lite" in _KIND) or ("v5e" in _KIND)
_TN_PREF = 128 if _IS_V5E else 256                 # v5e MXU is 128-wide; v6e/v7x prefer 256
if _IS_V5E or ("v6" in _KIND):
    _VMEM_LIMIT = 100 * 1024 * 1024                # 128 MiB physical VMEM on v5e/v6e
elif "7" in _KIND:
    _VMEM_LIMIT = 56 * 1024 * 1024                 # v7x: 64 MiB physical, leave headroom
else:
    _VMEM_LIMIT = None                             # unknown generation: keep compiler default


# ----------------------------------------------------------------------------------------
# Single-shot MXU matmul (full-K block, no reduction grid axis) with fused per-column
# scale/bias (folded eval-mode BN) + optional ReLU.  bf16 operands, f32 accumulate/epilogue.
# ----------------------------------------------------------------------------------------
def _mm_kernel(a_ref, w_ref, s_ref, b_ref, o_ref, *, relu):
    r = jnp.dot(a_ref[...], w_ref[...], preferred_element_type=jnp.float32)
    r = r * s_ref[...] + b_ref[...]
    if relu:
        r = jnp.maximum(r, 0.0)
    o_ref[...] = r.astype(o_ref.dtype)


@functools.lru_cache(maxsize=None)
def _get_matmul(Mp, Kp, Np, relu, tm, tn, out_dtype):
    kern = functools.partial(_mm_kernel, relu=relu)
    return pl.pallas_call(
        kern,
        out_shape=jax.ShapeDtypeStruct((Mp, Np), out_dtype),
        grid_spec=pltpu.PrefetchScalarGridSpec(
            num_scalar_prefetch=0,
            grid=(Mp // tm, Np // tn),
            in_specs=[
                pl.BlockSpec((tm, Kp), lambda i, j: (i, 0)),
                pl.BlockSpec((Kp, tn), lambda i, j: (0, j)),
                pl.BlockSpec((1, tn), lambda i, j: (0, j)),
                pl.BlockSpec((1, tn), lambda i, j: (0, j)),
            ],
            out_specs=pl.BlockSpec((tm, tn), lambda i, j: (i, j)),
        ),
        compiler_params=pltpu.CompilerParams(
            dimension_semantics=("parallel", "parallel"),
            vmem_limit_bytes=_VMEM_LIMIT),
    )


def matmul_scale_bias(a, w_p, s_p, b_p, relu, out_dtype=jnp.bfloat16):
    """act((a @ w) * scale + bias).  w_p/s_p/b_p are pre-padded to (Kp, Np)/(1, Np)."""
    M, K = a.shape
    Kp, Np = w_p.shape
    tm = min(256, _round_up(M, 8))
    Mp = _round_up(M, tm)
    tn = 256 if (Np % 256 == 0 and _TN_PREF == 256) else 128
    a_p = a.astype(jnp.bfloat16)
    if (Mp, Kp) != (M, K):
        a_p = jnp.pad(a_p, ((0, Mp - M), (0, Kp - K)))       # only the 7x7 stem im2col hits this
    out = _get_matmul(Mp, Kp, Np, bool(relu), tm, tn, out_dtype)(a_p, w_p, s_p, b_p)
    return out[:M] if Mp != M else out


# ----------------------------------------------------------------------------------------
# Grouped 3x3 conv (32 groups) + folded BN + ReLU.
# No im2col stack: the padded activation is flattened with a fixed row pitch (with garbage
# columns, stripped afterwards) so each tap is a pure static row shift; for stride 2, the 4
# parity planes are built once and each tap is a row shift inside one plane.  The kernel reads
# one (plane-rows, 128) slab per (batch, channel-tile) grid step and accumulates all 9 taps
# in-kernel (group-aware: only the matching 128-wide input slab is contracted).
# ----------------------------------------------------------------------------------------
def _gconv_kernel(x_ref, w_ref, s_ref, b_ref, o_ref, *, shifts, Mg, chunk):
    for c0 in range(0, Mg, chunk):
        cm = min(chunk, Mg - c0)
        acc = None
        for t, (plane, off) in enumerate(shifts):
            a = x_ref[0, plane, pl.ds(off + c0, cm), :]
            p = jnp.dot(a, w_ref[t, 0], preferred_element_type=jnp.float32)
            acc = p if acc is None else acc + p
        r = jnp.maximum(acc * s_ref[...] + b_ref[...], 0.0)
        o_ref[0, pl.ds(c0, cm), :] = r.astype(o_ref.dtype)


@functools.lru_cache(maxsize=None)
def _get_gconv(B, P, R, C, Mg, shifts):
    nt = C // 128
    chunk = min(Mg, 2048)                       # bounds the f32 accumulator / tap temps in VMEM
    kern = functools.partial(_gconv_kernel, shifts=shifts, Mg=Mg, chunk=chunk)
    return pl.pallas_call(
        kern,
        out_shape=jax.ShapeDtypeStruct((B, Mg, C), jnp.bfloat16),
        grid_spec=pltpu.PrefetchScalarGridSpec(
            num_scalar_prefetch=0,
            grid=(B, nt),
            in_specs=[
                pl.BlockSpec((1, P, R, 128), lambda b, j: (b, 0, 0, j)),
                pl.BlockSpec((9, 1, 128, 128), lambda b, j: (0, j, 0, 0)),
                pl.BlockSpec((1, 128), lambda b, j: (0, j)),
                pl.BlockSpec((1, 128), lambda b, j: (0, j)),
            ],
            out_specs=pl.BlockSpec((1, Mg, 128), lambda b, j: (b, 0, j)),
        ),
        compiler_params=pltpu.CompilerParams(
            dimension_semantics=("parallel", "parallel"),
            vmem_limit_bytes=_VMEM_LIMIT),
    )


def grouped_conv_bn_relu(x, w_blocks, scale2d, bias2d, stride):
    """3x3 grouped conv (pad=1) + BN + ReLU on NHWC bf16 (channels group-major, H/W even)."""
    B, H, W, C = x.shape
    xp = jnp.pad(x, ((0, 0), (1, 3), (1, 1), (0, 0)))        # 2 extra bottom rows = tap slack
    if stride == 1:
        Ho, Wo, pitch = H, W, W + 2
        planes = xp.reshape(B, 1, (H + 4) * (W + 2), C)
        shifts = tuple((0, di * pitch + dj) for di in range(3) for dj in range(3))
    else:                                                     # stride == 2
        Ho, Wo = H // 2, W // 2
        Hh, Wh = (H + 4) // 2, (W + 2) // 2
        pitch = Wh
        xr = xp.reshape(B, Hh, 2, Wh, 2, C)
        planes = jnp.transpose(xr, (0, 2, 4, 1, 3, 5)).reshape(B, 4, Hh * Wh, C)
        shifts = tuple((2 * (di % 2) + (dj % 2), (di // 2) * pitch + (dj // 2))
                       for di in range(3) for dj in range(3))
    Mg = Ho * pitch
    P, R = planes.shape[1], planes.shape[2]
    out = _get_gconv(B, P, R, C, Mg, shifts)(planes, w_blocks, scale2d, bias2d)
    return out.reshape(B, Ho, pitch, C)[:, :, :Wo, :]          # strip the garbage columns


# ----------------------------------------------------------------------------------------
# 3x3 / stride-2 ceil-mode max pool, fused: the kernel reads the even/odd-reshaped padded
# activation directly (no 9x window stack in HBM) and takes the running max of 9 static slices.
# ----------------------------------------------------------------------------------------
def _maxpool_kernel(x_ref, o_ref, *, Ho, Wo, C):
    x = x_ref[...]                       # (Ho+1, 2, Wo+1, 2C): even/odd split of padded H and W
    r = None
    for di in range(3):
        ah, ph = di // 2, di % 2
        for dj in range(3):
            aw, pw = dj // 2, dj % 2
            win = x[ah:ah + Ho, ph, aw:aw + Wo, pw * C:(pw + 1) * C]
            r = win if r is None else jnp.maximum(r, win)
    o_ref[...] = r


@functools.lru_cache(maxsize=None)
def _get_maxpool(B, Ho, Wo, C):
    kern = functools.partial(_maxpool_kernel, Ho=Ho, Wo=Wo, C=C)
    return pl.pallas_call(
        kern,
        out_shape=jax.ShapeDtypeStruct((B * Ho, Wo, C), jnp.bfloat16),
        grid_spec=pltpu.PrefetchScalarGridSpec(
            num_scalar_prefetch=0,
            grid=(B,),
            in_specs=[pl.BlockSpec((Ho + 1, 2, Wo + 1, 2 * C), lambda b: (b, 0, 0, 0))],
            out_specs=pl.BlockSpec((Ho, Wo, C), lambda b: (b, 0, 0)),
        ),
        compiler_params=pltpu.CompilerParams(
            dimension_semantics=("parallel",), vmem_limit_bytes=_VMEM_LIMIT),
    )


def maxpool3x3_s2_ceil(x):
    """nn.MaxPool2d(3, stride=2, ceil_mode=True) on NHWC bf16."""
    B, H, W, C = x.shape
    Ho = -(-(H - 3) // 2) + 1
    Wo = -(-(W - 3) // 2) + 1
    if (Ho - 1) * 2 >= H:
        Ho -= 1
    if (Wo - 1) * 2 >= W:
        Wo -= 1
    Hp, Wp = 2 * (Ho + 1), 2 * (Wo + 1)
    xp = jnp.pad(x, ((0, 0), (0, Hp - H), (0, Wp - W), (0, 0)), constant_values=-jnp.inf)
    xr = xp.reshape(B * (Ho + 1), 2, Wo + 1, 2 * C)      # pure reshape: even/odd H and W split
    out = _get_maxpool(B, Ho, Wo, C)(xr)
    return out.reshape(B, Ho, Wo, C)


# ----------------------------------------------------------------------------------------
# Global average pool (VPU-only per-step adds into an (8, C) scratch; one cross-sublane reduce
# in finalize), SE FCs, scale+residual+ReLU.
# ----------------------------------------------------------------------------------------
def _gap_kernel(x_ref, o_ref, acc_ref, *, inv_n):
    @pl.when(pl.program_id(1) == 0)
    def _():
        acc_ref[...] = jnp.zeros_like(acc_ref)

    acc_ref[...] += jnp.sum(x_ref[0].astype(jnp.float32), axis=0)    # (thw/8,8,C) -> (8,C), VPU

    @pl.when(pl.program_id(1) == pl.num_programs(1) - 1)
    def _():
        o_ref[0] = jnp.sum(acc_ref[...], axis=0, keepdims=True) * inv_n


@functools.lru_cache(maxsize=None)
def _get_gap(B, HWp, C, thw, inv_n):
    kern = functools.partial(_gap_kernel, inv_n=inv_n)
    return pl.pallas_call(
        kern,
        out_shape=jax.ShapeDtypeStruct((B, 1, C), jnp.float32),
        grid_spec=pltpu.PrefetchScalarGridSpec(
            num_scalar_prefetch=0,
            grid=(B, HWp // thw),
            in_specs=[pl.BlockSpec((1, thw // 8, 8, C), lambda b, k: (b, k, 0, 0))],
            out_specs=pl.BlockSpec((1, 1, C), lambda b, k: (b, 0, 0)),
            scratch_shapes=[pltpu.VMEM((8, C), jnp.float32)],
        ),
        compiler_params=pltpu.CompilerParams(
            dimension_semantics=("parallel", "arbitrary"),
            vmem_limit_bytes=_VMEM_LIMIT),
    )


def global_avg_pool(x_flat):
    """x_flat: (B, HW, C) -> (B, 1, C) f32 mean; zero padding along HW does not affect the sum."""
    B, HW, C = x_flat.shape
    thw = min(1024, _round_up(HW, 8))
    HWp = _round_up(HW, thw)
    if HWp != HW:
        x_flat = jnp.pad(x_flat, ((0, 0), (0, HWp - HW), (0, 0)))
    x4 = x_flat.reshape(B, HWp // 8, 8, C)                    # pure reshape (free)
    return _get_gap(B, HWp, C, thw, float(1.0 / HW))(x4)


def _se_fc_kernel(p_ref, w1_ref, b1_ref, w2_ref, b2_ref, o_ref):
    p = p_ref[...].astype(jnp.bfloat16)
    h = jnp.dot(p, w1_ref[...], preferred_element_type=jnp.float32) + b1_ref[...]
    h = jnp.maximum(h, 0.0).astype(jnp.bfloat16)
    s = jnp.dot(h, w2_ref[...], preferred_element_type=jnp.float32) + b2_ref[...]
    o_ref[...] = pl.reciprocal(1.0 + jnp.exp(-s), approx=True)       # sigmoid (EUP recip)


@functools.lru_cache(maxsize=None)
def _get_se_fc(B, C, Cr):
    return pl.pallas_call(
        _se_fc_kernel,
        out_shape=jax.ShapeDtypeStruct((B, C), jnp.float32),
        grid_spec=pltpu.PrefetchScalarGridSpec(
            num_scalar_prefetch=0,
            grid=(1,),
            in_specs=[
                pl.BlockSpec((B, C), lambda i: (0, 0)),
                pl.BlockSpec((C, Cr), lambda i: (0, 0)),
                pl.BlockSpec((1, Cr), lambda i: (0, 0)),
                pl.BlockSpec((Cr, C), lambda i: (0, 0)),
                pl.BlockSpec((1, C), lambda i: (0, 0)),
            ],
            out_specs=pl.BlockSpec((B, C), lambda i: (0, 0)),
        ),
    )


def _scale_res_kernel(x_ref, r_ref, s_ref, o_ref):
    x = x_ref[0].astype(jnp.float32)
    r = r_ref[0].astype(jnp.float32)
    o_ref[0] = jnp.maximum(x * s_ref[0] + r, 0.0).astype(o_ref.dtype)


@functools.lru_cache(maxsize=None)
def _get_scale_res(B, HWp, C, thw):
    return pl.pallas_call(
        _scale_res_kernel,
        out_shape=jax.ShapeDtypeStruct((B, HWp, C), jnp.bfloat16),
        grid_spec=pltpu.PrefetchScalarGridSpec(
            num_scalar_prefetch=0,
            grid=(B, HWp // thw),
            in_specs=[
                pl.BlockSpec((1, thw, C), lambda b, k: (b, k, 0)),
                pl.BlockSpec((1, thw, C), lambda b, k: (b, k, 0)),
                pl.BlockSpec((1, 1, C), lambda b, k: (b, 0, 0)),
            ],
            out_specs=pl.BlockSpec((1, thw, C), lambda b, k: (b, k, 0)),
        ),
        compiler_params=pltpu.CompilerParams(
            dimension_semantics=("parallel", "parallel"),
            vmem_limit_bytes=_VMEM_LIMIT),
    )


# ----------------------------------------------------------------------------------------
# Conv glue (reshape / strided slice for 1x1; im2col only for the tiny 7x7 stem).
# ----------------------------------------------------------------------------------------
def conv1x1_bn(x, w_p, scale_p, bias_p, stride, relu):
    B, H, W, Cin = x.shape
    if stride != 1:
        x = x[:, ::stride, ::stride, :]
        H, W = x.shape[1], x.shape[2]
    out = matmul_scale_bias(x.reshape(B * H * W, Cin), w_p, scale_p, bias_p, relu)
    return out.reshape(B, H, W, -1)


def conv_kxk_bn(x, w_p, kh, kw, scale_p, bias_p, stride, pad, relu):
    B, H, W, Cin = x.shape
    Ho = (H + 2 * pad - kh) // stride + 1
    Wo = (W + 2 * pad - kw) // stride + 1
    xp = jnp.pad(x, ((0, 0), (pad, pad), (pad, pad), (0, 0)))
    cols = [xp[:, di:di + stride * (Ho - 1) + 1:stride, dj:dj + stride * (Wo - 1) + 1:stride, :]
            for di in range(kh) for dj in range(kw)]
    a = jnp.stack(cols, axis=3).reshape(B * Ho * Wo, kh * kw * Cin)
    out = matmul_scale_bias(a, w_p, scale_p, bias_p, relu)
    return out.reshape(B, Ho, Wo, -1)


# ----------------------------------------------------------------------------------------
# Deterministic synthetic parameters (eval-mode BN folded; all weights pre-padded to multiples
# of 128 and pre-cast to bf16 at build time).
# ----------------------------------------------------------------------------------------
class ParamGen:
    def __init__(self, seed=0):
        self._key = jax.random.PRNGKey(seed)

    def _next(self):
        self._key, sub = jax.random.split(self._key)
        return sub

    def conv_w2d(self, kh, kw, cin, cout):
        fan_in = kh * kw * cin
        w = jax.random.normal(self._next(), (kh, kw, cin, cout), jnp.float32) / math.sqrt(fan_in)
        w2 = w.reshape(kh * kw * cin, cout)
        Kp, Np = _round_up(kh * kw * cin, 128), _round_up(cout, 128)
        w2 = jnp.pad(w2, ((0, Kp - kh * kw * cin), (0, Np - cout)))
        return w2.astype(jnp.bfloat16)

    def grouped_conv_blocks(self, c, groups):
        """3x3 grouped conv weight as (9, C//128, 128, 128) per-(tap, channel-tile) slabs."""
        cg = c // groups
        fan_in = 9 * cg
        wg = jax.random.normal(self._next(), (groups, 3, 3, cg, cg), jnp.float32) / math.sqrt(fan_in)
        nt = c // 128
        gpt = 128 // cg                         # groups covered by one 128-wide channel tile
        w3 = wg.reshape(nt, gpt, 9, cg, cg)     # (tile, local group, tap, cin_g, cout_g)
        eye = jnp.eye(gpt, dtype=jnp.float32)
        wb = jnp.einsum('jgpio,gh->pjgiho', w3, eye)         # block-diagonal inside each tile
        return wb.reshape(9, nt, 128, 128).astype(jnp.bfloat16)

    def bn(self, c, eps=1e-5):
        Np = _round_up(c, 128)
        gamma = 1.0 + 0.1 * jax.random.normal(self._next(), (c,), jnp.float32)
        beta = 0.01 * jax.random.normal(self._next(), (c,), jnp.float32)
        mean = jnp.zeros((c,), jnp.float32)
        var = jnp.ones((c,), jnp.float32)
        scale = gamma / jnp.sqrt(var + eps)
        bias = beta - scale * mean
        scale = jnp.pad(scale, (0, Np - c)).reshape(1, Np)
        bias = jnp.pad(bias, (0, Np - c)).reshape(1, Np)
        return scale, bias

    def linear_padded(self, cin, cout):
        w = jax.random.normal(self._next(), (cin, cout), jnp.float32) / math.sqrt(cin)
        b = 0.01 * jax.random.normal(self._next(), (cout,), jnp.float32)
        Kp, Np = _round_up(cin, 128), _round_up(cout, 128)
        w_p = jnp.pad(w, ((0, Kp - cin), (0, Np - cout))).astype(jnp.bfloat16)
        s_p = jnp.pad(jnp.ones((cout,), jnp.float32), (0, Np - cout)).reshape(1, Np)
        b_p = jnp.pad(b, (0, Np - cout)).reshape(1, Np)
        return w_p, s_p, b_p

    def se_linear(self, cin, cout):
        w = jax.random.normal(self._next(), (cin, cout), jnp.float32) / math.sqrt(cin)
        b = 0.01 * jax.random.normal(self._next(), (cout,), jnp.float32)
        return w.astype(jnp.bfloat16), b.reshape(1, cout).astype(jnp.float32)


def build_se_resnext101_params(seed=0, num_classes=5):
    # TODO(synk): pretrained weight loading (torch model_zoo) has no in-script equivalent;
    # synthetic folded-BN weights are generated deterministically instead.
    pg = ParamGen(seed)
    groups, reduction = 32, 16
    params = {'conv1_w': pg.conv_w2d(7, 7, 3, 64), 'bn1': pg.bn(64), 'num_classes': num_classes}
    layers_cfg = [(64, 3), (128, 4), (256, 23), (512, 3)]          # SE-ResNeXt-101 32x4d
    inplanes = 64
    all_layers = []
    for li, (planes, blocks) in enumerate(layers_cfg):
        block_list = []
        for b in range(blocks):
            stride = 2 if (li > 0 and b == 0) else 1
            width = (planes * 4 // 64) * groups                    # floor(planes*base_width/64)*groups
            p = {
                'c1_w': pg.conv_w2d(1, 1, inplanes, width), 'bn1': pg.bn(width),
                'c2_wb': pg.grouped_conv_blocks(width, groups), 'bn2': pg.bn(width),
                'c3_w': pg.conv_w2d(1, 1, width, planes * 4), 'bn3': pg.bn(planes * 4),
            }
            cr = planes * 4 // reduction
            p['se_w1'], p['se_b1'] = pg.se_linear(planes * 4, cr)
            p['se_w2'], p['se_b2'] = pg.se_linear(cr, planes * 4)
            if b == 0 and (stride != 1 or inplanes != planes * 4):
                p['ds_w'] = pg.conv_w2d(1, 1, inplanes, planes * 4)  # downsample_kernel_size=1
                p['ds_bn'] = pg.bn(planes * 4)
            block_list.append(p)
            inplanes = planes * 4
        all_layers.append(block_list)
    params['layers'] = all_layers
    params['clf_w'], params['clf_s'], params['clf_b'] = pg.linear_padded(512 * 4, num_classes)
    return params


# ----------------------------------------------------------------------------------------
# Forward pass (stem / bottleneck / head each compiled once per distinct shape by jax.jit).
# ----------------------------------------------------------------------------------------
def bottleneck_forward(x, p, *, stride):
    out = conv1x1_bn(x, p['c1_w'], *p['bn1'], stride=1, relu=True)
    out = grouped_conv_bn_relu(out, p['c2_wb'], *p['bn2'], stride=stride)
    out = conv1x1_bn(out, p['c3_w'], *p['bn3'], stride=1, relu=False)
    if 'ds_w' in p:
        residual = conv1x1_bn(x, p['ds_w'], *p['ds_bn'], stride=stride, relu=False)
    else:
        residual = x

    B, H, W, C = out.shape
    HW = H * W
    out_f = out.reshape(B, HW, C)
    res_f = residual.reshape(B, HW, C)

    pooled = global_avg_pool(out_f)                                 # (B, 1, C) f32
    Cr = p['se_w1'].shape[1]
    gate = _get_se_fc(B, C, Cr)(pooled.reshape(B, C), p['se_w1'], p['se_b1'],
                                p['se_w2'], p['se_b2'])             # (B, C) sigmoid gate

    thw = min(1024, _round_up(HW, 8))
    HWp = _round_up(HW, thw)
    if HWp != HW:
        out_f = jnp.pad(out_f, ((0, 0), (0, HWp - HW), (0, 0)))
        res_f = jnp.pad(res_f, ((0, 0), (0, HWp - HW), (0, 0)))
    fused = _get_scale_res(B, HWp, C, thw)(out_f, res_f, gate.reshape(B, 1, C))
    return fused[:, :HW].reshape(B, H, W, C)


_bottleneck_jit = jax.jit(bottleneck_forward, static_argnames=("stride",))


def stem_forward(x_nchw, w_p, bn_scale, bn_bias):
    x = jnp.transpose(x_nchw, (0, 2, 3, 1)).astype(jnp.bfloat16)    # NCHW -> NHWC, bf16
    # stem output channels come back zero-padded 64 -> 128 (lane-dense maxpool + no act pads)
    x = conv_kxk_bn(x, w_p, 7, 7, bn_scale, bn_bias, stride=2, pad=3, relu=True)
    return maxpool3x3_s2_ceil(x)


_stem_jit = jax.jit(stem_forward)


def head_forward(feats, clf_w, clf_s, clf_b, *, num_classes):
    B, H, W, C = feats.shape
    pooled = global_avg_pool(feats.reshape(B, H * W, C)).reshape(B, C)
    logits = matmul_scale_bias(pooled, clf_w, clf_s, clf_b, relu=False,
                               out_dtype=jnp.float32)[:, :num_classes]
    feats_nchw = jnp.transpose(feats, (0, 3, 1, 2)).astype(jnp.float32)  # PyTorch NCHW output
    return logits, feats_nchw


_head_jit = jax.jit(head_forward, static_argnames=("num_classes",))


def custom_se_resnext101_forward(x_nchw, params):
    x = _stem_jit(x_nchw, params['conv1_w'], params['bn1'][0], params['bn1'][1])
    for li, blocks in enumerate(params['layers']):
        for bi, p in enumerate(blocks):
            stride = 2 if (li > 0 and bi == 0) else 1
            x = _bottleneck_jit(x, p, stride=stride)
    return _head_jit(x, params['clf_w'], params['clf_s'], params['clf_b'],
                     num_classes=params['num_classes'])


if __name__ == "__main__":
    key = jax.random.PRNGKey(0)
    x = jax.random.normal(key, (2, 3, 64, 64), jnp.float32)          # small NCHW input
    params = build_se_resnext101_params(seed=0, num_classes=5)
    logits, feats = custom_se_resnext101_forward(x, params)
    jax.block_until_ready((logits, feats))
    assert logits.shape == (2, 5), logits.shape
    assert feats.shape == (2, 2048, 2, 2), feats.shape
    assert bool(jnp.all(jnp.isfinite(logits)))
    print("KERNEL_OK")
</pallas_src>

<mosaic_0001>
module attributes {stable_mosaic.version = 11 : i64} {
  func.func @_mm_kernel(%arg0: i32, %arg1: i32, %arg2: memref<256x256xbf16, #tpu.memory_space<vmem>>, %arg3: memref<256x128xbf16, #tpu.memory_space<vmem>>, %arg4: memref<1x128xf32, #tpu.memory_space<vmem>>, %arg5: memref<1x128xf32, #tpu.memory_space<vmem>>, %arg6: memref<256x128xbf16, #tpu.memory_space<vmem>>) attributes {dimension_semantics = [#tpu.dimension_semantics<parallel>, #tpu.dimension_semantics<parallel>], iteration_bounds = array<i64: 8, 1>, scalar_prefetch = 0 : i64, scratch_operands = 0 : i64, tpu.core_type = #tpu.core_type<tc>, window_params = [{transform_indices = @transform_0, window_bounds = array<i64: 256, 256>}, {transform_indices = @transform_1, window_bounds = array<i64: 256, 128>}, {transform_indices = @transform_2, window_bounds = array<i64: 1, 128>}, {transform_indices = @transform_3, window_bounds = array<i64: 1, 128>}, {transform_indices = @transform_4, window_bounds = array<i64: 256, 128>}]} {
    %c0 = arith.constant 0 : index
    %c0_0 = arith.constant 0 : index
    %0 = vector.load %arg2[%c0, %c0_0] : memref<256x256xbf16, #tpu.memory_space<vmem>>, vector<256x256xbf16>
    %c0_1 = arith.constant 0 : index
    %c0_2 = arith.constant 0 : index
    %1 = vector.load %arg3[%c0_1, %c0_2] : memref<256x128xbf16, #tpu.memory_space<vmem>>, vector<256x128xbf16>
    %cst = arith.constant dense<0.000000e+00> : vector<256x128xf32>
    %2 = tpu.matmul %0, %1, %cst {dimension_numbers = #tpu.dot_dimension_numbers<[1], [0], [0], [1], [0, 0, 1, 1], [], []>} : vector<256x256xbf16>, vector<256x128xbf16>, vector<256x128xf32> -> vector<256x128xf32>
    %c0_3 = arith.constant 0 : index
    %c0_4 = arith.constant 0 : index
    %3 = vector.load %arg4[%c0_3, %c0_4] : memref<1x128xf32, #tpu.memory_space<vmem>>, vector<1x128xf32>
    %4 = vector.broadcast %3 : vector<1x128xf32> to vector<256x128xf32>
    %5 = arith.mulf %2, %4 : vector<256x128xf32>
    %c0_5 = arith.constant 0 : index
    %c0_6 = arith.constant 0 : index
    %6 = vector.load %arg5[%c0_5, %c0_6] : memref<1x128xf32, #tpu.memory_space<vmem>>, vector<1x128xf32>
    %7 = vector.broadcast %6 : vector<1x128xf32> to vector<256x128xf32>
    %8 = arith.addf %5, %7 : vector<256x128xf32>
    %cst_7 = arith.constant 0.000000e+00 : f32
    %9 = vector.broadcast %cst_7 : f32 to vector<256x128xf32>
    %10 = arith.maximumf %8, %9 : vector<256x128xf32>
    %11 = arith.truncf %10 : vector<256x128xf32> to vector<256x128xbf16>
    %c0_8 = arith.constant 0 : index
    %c0_9 = arith.constant 0 : index
    %12 = vector.load %arg6[%c0_8, %c0_9] : memref<256x128xbf16, #tpu.memory_space<vmem>>, vector<256x128xbf16>
    tpu.vector_store %arg6[%c0_8, %c0_9], %11 {strides = array<i32>} : memref<256x128xbf16, #tpu.memory_space<vmem>>, vector<256x128xbf16>,
    return
  }
  func.func @transform_0(%arg0: i32, %arg1: i32) -> (i32, i32) {
    %c0_i32 = arith.constant 0 : i32
    %c0_i32_0 = arith.constant 0 : i32
    return %arg0, %c0_i32 : i32, i32
  }
  func.func @transform_1(%arg0: i32, %arg1: i32) -> (i32, i32) {
    %c0_i32 = arith.constant 0 : i32
    %c0_i32_0 = arith.constant 0 : i32
    return %c0_i32, %arg1 : i32, i32
  }
  func.func @transform_2(%arg0: i32, %arg1: i32) -> (i32, i32) {
    %c0_i32 = arith.constant 0 : i32
    %c0_i32_0 = arith.constant 0 : i32
    return %c0_i32, %arg1 : i32, i32
  }
  func.func @transform_3(%arg0: i32, %arg1: i32) -> (i32, i32) {
    %c0_i32 = arith.constant 0 : i32
    %c0_i32_0 = arith.constant 0 : i32
    return %c0_i32, %arg1 : i32, i32
  }
  func.func @transform_4(%arg0: i32, %arg1: i32) -> (i32, i32) {
    %c0_i32 = arith.constant 0 : i32
    return %arg0, %arg1 : i32, i32
  }
}

module attributes {stable_mosaic.version = 11 : i64} {
  func.func @_maxpool_kernel(%arg0: i32, %arg1: memref<17x2x17x256xbf16, #tpu.memory_space<vmem>>, %arg2: memref<16x16x128xbf16, #tpu.memory_space<vmem>>) attributes {dimension_semantics = [#tpu.dimension_semantics<parallel>], iteration_bounds = array<i64: 2>, scalar_prefetch = 0 : i64, scratch_operands = 0 : i64, tpu.core_type = #tpu.core_type<tc>, window_params = [{transform_indices = @transform_0, window_bounds = array<i64: 17, 2, 17, 256>}, {transform_indices = @transform_1, window_bounds = array<i64: 16, 16, 128>}]} {
    %c0 = arith.constant 0 : index
    %c0_0 = arith.constant 0 : index
    %c0_1 = arith.constant 0 : index
    %c0_2 = arith.constant 0 : index
    %0 = vector.load %arg1[%c0, %c0_0, %c0_1, %c0_2] : memref<17x2x17x256xbf16, #tpu.memory_space<vmem>>, vector<17x2x17x256xbf16>
    %1 = vector.extract_strided_slice %0 {offsets = [0, 0, 0, 0], sizes = [16, 1, 16, 128], strides = [1, 1, 1, 1]} : vector<17x2x17x256xbf16> to vector<16x1x16x128xbf16>
    %2 = vector.shape_cast %1 : vector<16x1x16x128xbf16> to vector<16x16x128xbf16>
    %3 = vector.extract_strided_slice %0 {offsets = [0, 0, 0, 128], sizes = [16, 1, 16, 128], strides = [1, 1, 1, 1]} : vector<17x2x17x256xbf16> to vector<16x1x16x128xbf16>
    %4 = vector.shape_cast %3 : vector<16x1x16x128xbf16> to vector<16x16x128xbf16>
    %5 = arith.maximumf %2, %4 : vector<16x16x128xbf16>
    %6 = vector.extract_strided_slice %0 {offsets = [0, 0, 1, 0], sizes = [16, 1, 16, 128], strides = [1, 1, 1, 1]} : vector<17x2x17x256xbf16> to vector<16x1x16x128xbf16>
    %7 = vector.shape_cast %6 : vector<16x1x16x128xbf16> to vector<16x16x128xbf16>
    %8 = arith.maximumf %5, %7 : vector<16x16x128xbf16>
    %9 = vector.extract_strided_slice %0 {offsets = [0, 1, 0, 0], sizes = [16, 1, 16, 128], strides = [1, 1, 1, 1]} : vector<17x2x17x256xbf16> to vector<16x1x16x128xbf16>
    %10 = vector.shape_cast %9 : vector<16x1x16x128xbf16> to vector<16x16x128xbf16>
    %11 = arith.maximumf %8, %10 : vector<16x16x128xbf16>
    %12 = vector.extract_strided_slice %0 {offsets = [0, 1, 0, 128], sizes = [16, 1, 16, 128], strides = [1, 1, 1, 1]} : vector<17x2x17x256xbf16> to vector<16x1x16x128xbf16>
    %13 = vector.shape_cast %12 : vector<16x1x16x128xbf16> to vector<16x16x128xbf16>
    %14 = arith.maximumf %11, %13 : vector<16x16x128xbf16>
    %15 = vector.extract_strided_slice %0 {offsets = [0, 1, 1, 0], sizes = [16, 1, 16, 128], strides = [1, 1, 1, 1]} : vector<17x2x17x256xbf16> to vector<16x1x16x128xbf16>
    %16 = vector.shape_cast %15 : vector<16x1x16x128xbf16> to vector<16x16x128xbf16>
    %17 = arith.maximumf %14, %16 : vector<16x16x128xbf16>
    %18 = vector.extract_strided_slice %0 {offsets = [1, 0, 0, 0], sizes = [16, 1, 16, 128], strides = [1, 1, 1, 1]} : vector<17x2x17x256xbf16> to vector<16x1x16x128xbf16>
    %19 = vector.shape_cast %18 : vector<16x1x16x128xbf16> to vector<16x16x128xbf16>
    %20 = arith.maximumf %17, %19 : vector<16x16x128xbf16>
    %21 = vector.extract_strided_slice %0 {offsets = [1, 0, 0, 128], sizes = [16, 1, 16, 128], strides = [1, 1, 1, 1]} : vector<17x2x17x256xbf16> to vector<16x1x16x128xbf16>
    %22 = vector.shape_cast %21 : vector<16x1x16x128xbf16> to vector<16x16x128xbf16>
    %23 = arith.maximumf %20, %22 : vector<16x16x128xbf16>
    %24 = vector.extract_strided_slice %0 {offsets = [1, 0, 1, 0], sizes = [16, 1, 16, 128], strides = [1, 1, 1, 1]} : vector<17x2x17x256xbf16> to vector<16x1x16x128xbf16>
    %25 = vector.shape_cast %24 : vector<16x1x16x128xbf16> to vector<16x16x128xbf16>
    %26 = arith.maximumf %23, %25 : vector<16x16x128xbf16>
    %c0_3 = arith.constant 0 : index
    %c0_4 = arith.constant 0 : index
    %c0_5 = arith.constant 0 : index
    %27 = vector.load %arg2[%c0_3, %c0_4, %c0_5] : memref<16x16x128xbf16, #tpu.memory_space<vmem>>, vector<16x16x128xbf16>
    tpu.vector_store %arg2[%c0_3, %c0_4, %c0_5], %26 {strides = array<i32>} : memref<16x16x128xbf16, #tpu.memory_space<vmem>>, vector<16x16x128xbf16>,
    return
  }
  func.func @transform_0(%arg0: i32) -> (i32, i32, i32, i32) {
    %c0_i32 = arith.constant 0 : i32
    %c0_i32_0 = arith.constant 0 : i32
    %c0_i32_1 = arith.constant 0 : i32
    %c0_i32_2 = arith.constant 0 : i32
    return %arg0, %c0_i32, %c0_i32_0, %c0_i32_1 : i32, i32, i32, i32
  }
  func.func @transform_1(%arg0: i32) -> (i32, i32, i32) {
    %c0_i32 = arith.constant 0 : i32
    %c0_i32_0 = arith.constant 0 : i32
    %c0_i32_1 = arith.constant 0 : i32
    return %arg0, %c0_i32, %c0_i32_0 : i32, i32, i32
  }
}

</mosaic_0001>

<bundles_post_ra>
// kernel: stem_forward.2
= control target key start
LH: loop header
LB: loop body
LE: loop exit
PB: predicated region body
PF: predicated region fallthrough
CT: control target
= control target key end

     0   :  { %s1625_s15 = smov 0   ;;  %s1627_s16 = smov 0   ;;  %s1836_s0 = inlined_call_operand.vmem [shape: bf16[2048,256], index: 0, kind: input, shape index: {}]   ;;  %s1837_s1 = inlined_call_operand.vmem [shape: bf16[256,128], index: 1, kind: input, shape index: {}]   ;;  %s1838_s2 = inlined_call_operand.vmem [shape: f32[1,128], index: 2, kind: input, shape index: {}]   ;;  %s1839_s3 = inlined_call_operand.vmem [shape: f32[1,128], index: 3, kind: input, shape index: {}]   ;;  %s1840_s4 = inlined_call_operand.vmem [shape: bf16[2048,128], index: 4, kind: output, shape index: {}]  }
   0x1   :  { %s1629_s17 = smov 0  }
   0x2 LB: > { %s26_s18 = sadd.s32 1, %s1594_s16  ;;  %p1142_p0 = scmp.ge.s32.totalorder %s1598_s17, 1  ;;  %s1598_s17 = sphi %s1629_s17, %s14_s17   ;;  %s1594_s16 = sphi %s1627_s16, %s1842_s16   ;;  %s1590_s15 = sphi %s1625_s15, %s1841_s15  }
   0x3   : > { %p28_p1 = scmp.ge.s32.totalorder %s26_s18, 8  ;;  %p203_p2 = scmp.lt.s32.totalorder %s1598_s17, 9 }
   0x5   : > { %s1844_s18 = smov (%p28_p1, %s26_s18), 0  ;;  %p204_p3 = pnand %p1142_p0, %p203_p2 }
   0x6   : > { %v1512_v0 = vld [vmem:[%s1837_s1 + $0x40] sm:$0xff] (!%p204_p3)   ;;  %s1143_s21 = sshll.u32 (!%p204_p3), %s1590_s15, 5  ;;  %v1514_v2 = vld [vmem:[%s1837_s1 + $0x48] sm:$0xff] (!%p204_p3)   ;;  %v1516_v4 = vld [vmem:[%s1837_s1 + $0x50] sm:$0xff] (!%p204_p3)  }
   0x7   : > { %207 = sbr.rel (%p204_p3) target bundleno = 322 (0x142), region = 36  ;;  %v1513_v1 = vld [vmem:[%s1837_s1] sm:$0xff] (!%p204_p3)   ;;  %1360 = vmatprep.subr.bf16.mxu0 (!%p204_p3), %v1512_v0  ;;  %1472 = vmatprep.subr.bf16.mxu1 (!%p204_p3), %v1512_v0  ;;  %v1515_v3 = vld [vmem:[%s1837_s1 + $0x8] sm:$0xff] (!%p204_p3)   ;;  %p244_p4 = scmp.lt.s32.totalorder (!%p204_p3), %s1143_s21, 255  ;;  %v1517_v5 = vld [vmem:[%s1837_s1 + $0x10] sm:$0xff] (!%p204_p3)  }
   0x8   : > { %1361 = vmatpush3.bf16.msra.mxu0 (!%p204_p3), %v1513_v1  ;;  %1480 = vmatpush3.bf16.msra.mxu1 (!%p204_p3), %v1513_v1  ;;  %v1518_v6 = vld [vmem:[%s1837_s1 + $0x58] sm:$0xff] (!%p204_p3)   ;;  %v1520_v8 = vld [vmem:[%s1837_s1 + $0x60] sm:$0xff] (!%p204_p3)   ;;  %v1522_v10 = vld [vmem:[%s1837_s1 + $0x68] sm:$0xff] (!%p204_p3)  }
   0x9   : > { %1362 = vmatprep.subr.bf16.mxu0 (!%p204_p3), %v1514_v2  ;;  %1473 = vmatprep.subr.bf16.mxu1 (!%p204_p3), %v1514_v2  ;;  %v1519_v7 = vld [vmem:[%s1837_s1 + $0x18] sm:$0xff] (!%p204_p3)   ;;  %v1521_v9 = vld [vmem:[%s1837_s1 + $0x20] sm:$0xff] (!%p204_p3)   ;;  %v1523_v13 = vld [vmem:[%s1837_s1 + $0x28] sm:$0xff] (!%p204_p3)  }
   0xa   : > { %v1524_v14 = vld [vmem:[%s1837_s1 + $0x70] sm:$0xff] (!%p204_p3)   ;;  %v1526_v16 = vld [vmem:[%s1837_s1 + $0x78] sm:$0xff] (!%p204_p3)   ;;  %v1734_v51 = vld [vmem:[%s1838_s2] ss:$0 sm:$0xff] (!%p204_p3) }
   0xb   : > { %v1525_v15 = vld [vmem:[%s1837_s1 + $0x30] sm:$0xff] (!%p204_p3)   ;;  %v1527_v17 = vld [vmem:[%s1837_s1 + $0x38] sm:$0xff] (!%p204_p3)   ;;  %v1739_v57 = vld [vmem:[%s1839_s3] ss:$0 sm:$0xff] (!%p204_p3) }
   0xc   : > { %1363 = vmatpush3.bf16.msra.mxu0 (!%p204_p3), %v1515_v3  ;;  %1481 = vmatpush3.bf16.msra.mxu1 (!%p204_p3), %v1515_v3 }
   0xd   : > { %1364 = vmatprep.subr.bf16.mxu0 (!%p204_p3), %v1516_v4  ;;  %1474 = vmatprep.subr.bf16.mxu1 (!%p204_p3), %v1516_v4 }
   0xe   : > { %s1846_s21 = smov (!%p244_p4, %s1143_s21), 255 }
   0xf   : > { %s1232_s10 = sshll.u32 %s1846_s21, 3  ;;  %s1147_s12 = sshll.u32 %s1846_s21, 2 }
  0x10   : > { %1365 = vmatpush3.bf16.msra.mxu0 %v1517_v5  ;;  %1482 = vmatpush3.bf16.msra.mxu1 %v1517_v5  ;;  %s1676_s15 = scalar_lea.vmem %s1836_s0, %s1232_s10  ;;  %s1753_s21 = scalar_lea.vmem %s1840_s4, %s1147_s12 }
  0x11   : > { %1366 = vmatprep.subr.bf16.mxu0 %v1518_v6  ;;  %1475 = vmatprep.subr.bf16.mxu1 %v1518_v6  ;;  %v1530_v11 = vld [vmem:[%s1676_s15 + $0x4] ss:$8 sps:$4 sm:$0xff]   ;;  %v1528_v18 = vld [vmem:[%s1676_s15] ss:$8 sps:$4 sm:$0xff]   ;;  %v1534_v20 = vld [vmem:[%s1676_s15 + $0x14] ss:$8 sps:$4 sm:$0xff]  }
  0x12   : > { %v1533_v12 = vld [vmem:[%s1676_s15 + $0x84] ss:$8 sps:$4 sm:$0xff]   ;;  %622 = vmatprep.mubr.bf16.mxu0 %v1530_v11  ;;  %v1531_v19 = vld [vmem:[%s1676_s15 + $0x80] ss:$8 sps:$4 sm:$0xff]   ;;  %v1536_v21 = vld [vmem:[%s1676_s15 + $0x94] ss:$8 sps:$4 sm:$0xff]  }
  0x13   : > { %686 = vmatprep.mubr.bf16.mxu1 %v1533_v12  ;;  %v1538_v22 = vld [vmem:[%s1676_s15 + $0x10] ss:$8 sps:$4 sm:$0xff]   ;;  %v1540_v24 = vld [vmem:[%s1676_s15 + $0x24] ss:$8 sps:$4 sm:$0xff]   ;;  %v1544_v26 = vld [vmem:[%s1676_s15 + $0x20] ss:$8 sps:$4 sm:$0xff]  }
  0x14   : > { %1367 = vmatpush3.bf16.msra.mxu0 %v1519_v7  ;;  %1483 = vmatpush3.bf16.msra.mxu1 %v1519_v7  ;;  %v1539_v23 = vld [vmem:[%s1676_s15 + $0x90] ss:$8 sps:$4 sm:$0xff]   ;;  %v1542_v25 = vld [vmem:[%s1676_s15 + $0xa4] ss:$8 sps:$4 sm:$0xff]   ;;  %v1545_v27 = vld [vmem:[%s1676_s15 + $0xa0] ss:$8 sps:$4 sm:$0xff]  }
  0x15   : > { %1368 = vmatprep.subr.bf16.mxu0 %v1520_v8  ;;  %1476 = vmatprep.subr.bf16.mxu1 %v1520_v8  ;;  %v1546_v28 = vld [vmem:[%s1676_s15 + $0x34] ss:$8 sps:$4 sm:$0xff]   ;;  %v1550_v30 = vld [vmem:[%s1676_s15 + $0x30] ss:$8 sps:$4 sm:$0xff]   ;;  %v1552_v32 = vld [vmem:[%s1676_s15 + $0x44] ss:$8 sps:$4 sm:$0xff]  }
  0x16   : > { %v1548_v29 = vld [vmem:[%s1676_s15 + $0xb4] ss:$8 sps:$4 sm:$0xff]   ;;  %v1551_v31 = vld [vmem:[%s1676_s15 + $0xb0] ss:$8 sps:$4 sm:$0xff]   ;;  %v1554_v33 = vld [vmem:[%s1676_s15 + $0xc4] ss:$8 sps:$4 sm:$0xff]  }
  0x17   : > { %v1556_v34 = vld [vmem:[%s1676_s15 + $0x40] ss:$8 sps:$4 sm:$0xff]   ;;  %v1558_v36 = vld [vmem:[%s1676_s15 + $0x54] ss:$8 sps:$4 sm:$0xff]   ;;  %v1562_v38 = vld [vmem:[%s1676_s15 + $0x50] ss:$8 sps:$4 sm:$0xff]  }
  0x18   : > { %1369 = vmatpush3.bf16.msra.mxu0 %v1521_v9  ;;  %1484 = vmatpush3.bf16.msra.mxu1 %v1521_v9  ;;  %v1557_v35 = vld [vmem:[%s1676_s15 + $0xc0] ss:$8 sps:$4 sm:$0xff]   ;;  %v1560_v37 = vld [vmem:[%s1676_s15 + $0xd4] ss:$8 sps:$4 sm:$0xff]   ;;  %v1563_v39 = vld [vmem:[%s1676_s15 + $0xd0] ss:$8 sps:$4 sm:$0xff]  }
  0x19   : > { %1370 = vmatprep.subr.bf16.mxu0 %v1522_v10  ;;  %1477 = vmatprep.subr.bf16.mxu1 %v1522_v10  ;;  %v1564_v40 = vld [vmem:[%s1676_s15 + $0x64] ss:$8 sps:$4 sm:$0xff]   ;;  %v1568_v42 = vld [vmem:[%s1676_s15 + $0x60] ss:$8 sps:$4 sm:$0xff]   ;;  %v1570_v44 = vld [vmem:[%s1676_s15 + $0x74] ss:$8 sps:$4 sm:$0xff]  }
  0x1a   : > { %v1566_v41 = vld [vmem:[%s1676_s15 + $0xe4] ss:$8 sps:$4 sm:$0xff]   ;;  %v1569_v43 = vld [vmem:[%s1676_s15 + $0xe0] ss:$8 sps:$4 sm:$0xff]   ;;  %v1572_v45 = vld [vmem:[%s1676_s15 + $0xf4] ss:$8 sps:$4 sm:$0xff]  }
  0x1b   : > { %v1574_v46 = vld [vmem:[%s1676_s15 + $0x70] ss:$8 sps:$4 sm:$0xff]  }
  0x1c   : > { %1371 = vmatpush3.bf16.msra.mxu0 %v1523_v13  ;;  %1485 = vmatpush3.bf16.msra.mxu1 %v1523_v13  ;;  %v1575_v47 = vld [vmem:[%s1676_s15 + $0xf0] ss:$8 sps:$4 sm:$0xff]  }
  0x1d   : > { %1372 = vmatprep.subr.bf16.mxu0 %v1524_v14  ;;  %1478 = vmatprep.subr.bf16.mxu1 %v1524_v14 }
  0x20   : > { %1373 = vmatpush3.bf16.msra.mxu0 %v1525_v15  ;;  %1486 = vmatpush3.bf16.msra.mxu1 %v1525_v15 }
  0x21   : > { %1374 = vmatprep.subr.bf16.mxu0 %v1526_v16  ;;  %1479 = vmatprep.subr.bf16.mxu1 %v1526_v16 }
  0x24   : > { %1375 = vmatpush3.bf16.msra.mxu0 %v1527_v17  ;;  %1487 = vmatpush3.bf16.msra.mxu1 %v1527_v17 }
  0x27   : > { %623 = vmatmul.mubr.bf16.vlgmr.msra.gmra.mrb[0].mxu0 %v1528_v18  ;;  %687 = vmatmul.mubr.bf16.vlgmr.msra.gmra.mrb[0].mxu1 %v1531_v19 }
  0x28   : > { %630 = vmatprep.mubr.bf16.mxu0 %v1534_v20  ;;  %694 = vmatprep.mubr.bf16.mxu1 %v1536_v21 }
  0x2f   : > { %631 = vmatmul.mubr.bf16.gmra.mrb[4].mxu0 %v1538_v22  ;;  %695 = vmatmul.mubr.bf16.gmra.mrb[4].mxu1 %v1539_v23 }
  0x30   : > { %638 = vmatprep.mubr.bf16.mxu0 %v1540_v24  ;;  %702 = vmatprep.mubr.bf16.mxu1 %v1542_v25 }
  0x37   : > { %639 = vmatmul.mubr.bf16.gmra.mrb[8].mxu0 %v1544_v26  ;;  %703 = vmatmul.mubr.bf16.gmra.mrb[8].mxu1 %v1545_v27 }
  0x38   : > { %646 = vmatprep.mubr.bf16.mxu0 %v1546_v28  ;;  %710 = vmatprep.mubr.bf16.mxu1 %v1548_v29 }
  0x3f   : > { %647 = vmatmul.mubr.bf16.gmra.mrb[12].mxu0 %v1550_v30  ;;  %711 = vmatmul.mubr.bf16.gmra.mrb[12].mxu1 %v1551_v31 }
  0x40   : > { %654 = vmatprep.mubr.bf16.mxu0 %v1552_v32  ;;  %718 = vmatprep.mubr.bf16.mxu1 %v1554_v33 }
  0x47   : > { %655 = vmatmul.mubr.bf16.gmra.mrb[16].mxu0 %v1556_v34  ;;  %719 = vmatmul.mubr.bf16.gmra.mrb[16].mxu1 %v1557_v35 }
  0x48   : > { %662 = vmatprep.mubr.bf16.mxu0 %v1558_v36  ;;  %726 = vmatprep.mubr.bf16.mxu1 %v1560_v37 }
  0x4f   : > { %663 = vmatmul.mubr.bf16.gmra.mrb[20].mxu0 %v1562_v38  ;;  %727 = vmatmul.mubr.bf16.gmra.mrb[20].mxu1 %v1563_v39 }
  0x50   : > { %670 = vmatprep.mubr.bf16.mxu0 %v1564_v40  ;;  %734 = vmatprep.mubr.bf16.mxu1 %v1566_v41 }
  0x57   : > { %671 = vmatmul.mubr.bf16.gmra.mrb[24].mxu0 %v1568_v42  ;;  %735 = vmatmul.mubr.bf16.gmra.mrb[24].mxu1 %v1569_v43 }
  0x58   : > { %678 = vmatprep.mubr.bf16.mxu0 %v1570_v44  ;;  %742 = vmatprep.mubr.bf16.mxu1 %v1572_v45 }
  0x5f   : > { %679 = vmatmul.mubr.bf16.gmra.mrb[28].mxu0 %v1574_v46  ;;  %743 = vmatmul.mubr.bf16.gmra.mrb[28].mxu1 %v1575_v47 }
  0xfa   : > { %v1376_v48 = vpop.f32.mrb[0].mxu0  ;;  %v1424_v49 = vpop.f32.mrb[0].mxu1 }
  0xfb   : > { %v1377_v50 = vpop.f32.mrb[1].mxu0  ;;  %v1425_v52 = vpop.f32.mrb[1].mxu1 }
  0xfc   : > { %v1378_v53 = vadd.f32 %v1377_v50, %v1376_v48  ;;  %v1426_v54 = vadd.f32 %v1425_v52, %v1424_v49  ;;  %v1379_v55 = vpop.f32.mrb[2].mxu0  ;;  %v1427_v56 = vpop.f32.mrb[2].mxu1 }
  0xfd   : > { %v1380_v58 = vpop.f32.mrb[3].mxu0  ;;  %v1428_v59 = vpop.f32.mrb[3].mxu1 }
  0xfe   : > { %v758_v60 = vmul.f32 %v1378_v53, %v1734_v51  ;;  %v774_v61 = vmul.f32 %v1426_v54, %v1734_v51  ;;  %v1381_v62 = vadd.f32 %v1380_v58, %v1379_v55  ;;  %v1429_v63 = vadd.f32 %v1428_v59, %v1427_v56 }
 0x100   : > { %v797_v0 = vadd.f32 %v1739_v57, %v758_v60  ;;  %v813_v1 = vadd.f32 %v1739_v57, %v774_v61  ;;  %v759_v2 = vmul.f32 %v1381_v62, %v1734_v51  ;;  %v775_v3 = vmul.f32 %v1429_v63, %v1734_v51 }
 0x102   : > { %v798_v4 = vadd.f32 %v1739_v57, %v759_v2  ;;  %v814_v5 = vadd.f32 %v1739_v57, %v775_v3  ;;  %v1382_v6 = vpop.f32.mrb[4].mxu0  ;;  %v1430_v7 = vpop.f32.mrb[4].mxu1  ;;  %v829_v8 = vmax.f32 %v797_v0, 0.0  ;;  %v845_v9 = vmax.f32 %v813_v1, 0.0 }
 0x103   : > { %v1383_v10 = vpop.f32.mrb[5].mxu0  ;;  %v1431_v11 = vpop.f32.mrb[5].mxu1 }
 0x104   : > { %v830_v12 = vmax.f32 %v798_v4, 0.0  ;;  %v846_v13 = vmax.f32 %v814_v5, 0.0  ;;  %v1384_v14 = vadd.f32 %v1383_v10, %v1382_v6  ;;  %v1432_v15 = vadd.f32 %v1431_v11, %v1430_v7  ;;  %v1385_v16 = vpop.f32.mrb[6].mxu0  ;;  %v1433_v17 = vpop.f32.mrb[6].mxu1 }
 0x105   : > { %v1386_v18 = vpop.f32.mrb[7].mxu0  ;;  %v1434_v19 = vpop.f32.mrb[7].mxu1 }
 0x106   : > { %v1268_v20 = vpack.c.bf16 %v830_v12, %v829_v8  ;;  %v1308_v21 = vpack.c.bf16 %v846_v13, %v845_v9  ;;  %v760_v22 = vmul.f32 %v1384_v14, %v1734_v51  ;;  %v776_v23 = vmul.f32 %v1432_v15, %v1734_v51 }
 0x107   : > { %v1387_v24 = vadd.f32 %v1386_v18, %v1385_v16  ;;  %v1435_v25 = vadd.f32 %v1434_v19, %v1433_v17 }
 0x108   : > { %1269 = vst [vmem:[%s1753_s21] sm:$0xff] %v1268_v20   ;;  %1352 = vst [vmem:[%s1753_s21 + $0x40] sm:$0xff] %v1308_v21   ;;  %v799_v26 = vadd.f32 %v1739_v57, %v760_v22  ;;  %v815_v27 = vadd.f32 %v1739_v57, %v776_v23 }
 0x109   : > { %v761_v28 = vmul.f32 %v1387_v24, %v1734_v51  ;;  %v777_v29 = vmul.f32 %v1435_v25, %v1734_v51 }
 0x10a   : > { %v1388_v30 = vpop.f32.mrb[8].mxu0  ;;  %v1436_v31 = vpop.f32.mrb[8].mxu1  ;;  %v831_v40 = vmax.f32 %v799_v26, 0.0  ;;  %v847_v41 = vmax.f32 %v815_v27, 0.0 }
 0x10b   : > { %v800_v32 = vadd.f32 %v1739_v57, %v761_v28  ;;  %v816_v33 = vadd.f32 %v1739_v57, %v777_v29  ;;  %v1389_v34 = vpop.f32.mrb[9].mxu0  ;;  %v1437_v35 = vpop.f32.mrb[9].mxu1 }
 0x10c   : > { %v1390_v36 = vadd.f32 %v1389_v34, %v1388_v30  ;;  %v1438_v37 = vadd.f32 %v1437_v35, %v1436_v31  ;;  %v1391_v38 = vpop.f32.mrb[10].mxu0  ;;  %v1439_v39 = vpop.f32.mrb[10].mxu1 }
 0x10d   : > { %v832_v42 = vmax.f32 %v800_v32, 0.0  ;;  %v848_v43 = vmax.f32 %v816_v33, 0.0  ;;  %v1392_v44 = vpop.f32.mrb[11].mxu0  ;;  %v1440_v45 = vpop.f32.mrb[11].mxu1 }
 0x10e   : > { %v762_v46 = vmul.f32 %v1390_v36, %v1734_v51  ;;  %v778_v47 = vmul.f32 %v1438_v37, %v1734_v51  ;;  %v1393_v48 = vadd.f32 %v1392_v44, %v1391_v38  ;;  %v1441_v49 = vadd.f32 %v1440_v45, %v1439_v39 }
 0x10f   : > { %v1273_v50 = vpack.c.bf16 %v832_v42, %v831_v40  ;;  %v1313_v52 = vpack.c.bf16 %v848_v43, %v847_v41 }
 0x110   : > { %v801_v53 = vadd.f32 %v1739_v57, %v762_v46  ;;  %v817_v54 = vadd.f32 %v1739_v57, %v778_v47  ;;  %v763_v55 = vmul.f32 %v1393_v48, %v1734_v51  ;;  %v779_v56 = vmul.f32 %v1441_v49, %v1734_v51 }
 0x111   : > { %1345 = vst [vmem:[%s1753_s21 + $0x8] sm:$0xff] %v1273_v50   ;;  %1353 = vst [vmem:[%s1753_s21 + $0x48] sm:$0xff] %v1313_v52  }
 0x112   : > { %v802_v58 = vadd.f32 %v1739_v57, %v763_v55  ;;  %v818_v59 = vadd.f32 %v1739_v57, %v779_v56  ;;  %v1394_v60 = vpop.f32.mrb[12].mxu0  ;;  %v1442_v61 = vpop.f32.mrb[12].mxu1  ;;  %v833_v62 = vmax.f32 %v801_v53, 0.0  ;;  %v849_v63 = vmax.f32 %v817_v54, 0.0 }
 0x113   : > { %v1395_v0 = vpop.f32.mrb[13].mxu0  ;;  %v1443_v1 = vpop.f32.mrb[13].mxu1 }
 0x114   : > { %v834_v2 = vmax.f32 %v802_v58, 0.0  ;;  %v850_v3 = vmax.f32 %v818_v59, 0.0  ;;  %v1396_v4 = vadd.f32 %v1395_v0, %v1394_v60  ;;  %v1444_v5 = vadd.f32 %v1443_v1, %v1442_v61  ;;  %v1397_v6 = vpop.f32.mrb[14].mxu0  ;;  %v1445_v7 = vpop.f32.mrb[14].mxu1 }
 0x115   : > { %v1398_v8 = vpop.f32.mrb[15].mxu0  ;;  %v1446_v9 = vpop.f32.mrb[15].mxu1 }
 0x116   : > { %v1278_v10 = vpack.c.bf16 %v834_v2, %v833_v62  ;;  %v1318_v11 = vpack.c.bf16 %v850_v3, %v849_v63  ;;  %v764_v12 = vmul.f32 %v1396_v4, %v1734_v51  ;;  %v780_v13 = vmul.f32 %v1444_v5, %v1734_v51 }
 0x117   : > { %v1399_v14 = vadd.f32 %v1398_v8, %v1397_v6  ;;  %v1447_v15 = vadd.f32 %v1446_v9, %v1445_v7 }
 0x118   : > { %1346 = vst [vmem:[%s1753_s21 + $0x10] sm:$0xff] %v1278_v10   ;;  %1354 = vst [vmem:[%s1753_s21 + $0x50] sm:$0xff] %v1318_v11   ;;  %v803_v16 = vadd.f32 %v1739_v57, %v764_v12  ;;  %v819_v17 = vadd.f32 %v1739_v57, %v780_v13 }
 0x119   : > { %v765_v18 = vmul.f32 %v1399_v14, %v1734_v51  ;;  %v781_v19 = vmul.f32 %v1447_v15, %v1734_v51 }
 0x11a   : > { %v1400_v20 = vpop.f32.mrb[16].mxu0  ;;  %v1448_v21 = vpop.f32.mrb[16].mxu1  ;;  %v835_v30 = vmax.f32 %v803_v16, 0.0  ;;  %v851_v31 = vmax.f32 %v819_v17, 0.0 }
 0x11b   : > { %v804_v22 = vadd.f32 %v1739_v57, %v765_v18  ;;  %v820_v23 = vadd.f32 %v1739_v57, %v781_v19  ;;  %v1401_v24 = vpop.f32.mrb[17].mxu0  ;;  %v1449_v25 = vpop.f32.mrb[17].mxu1 }
 0x11c   : > { %v1402_v26 = vadd.f32 %v1401_v24, %v1400_v20  ;;  %v1450_v27 = vadd.f32 %v1449_v25, %v1448_v21  ;;  %v1403_v28 = vpop.f32.mrb[18].mxu0  ;;  %v1451_v29 = vpop.f32.mrb[18].mxu1 }
 0x11d   : > { %v836_v32 = vmax.f32 %v804_v22, 0.0  ;;  %v852_v33 = vmax.f32 %v820_v23, 0.0  ;;  %v1404_v34 = vpop.f32.mrb[19].mxu0  ;;  %v1452_v35 = vpop.f32.mrb[19].mxu1 }
 0x11e   : > { %v766_v36 = vmul.f32 %v1402_v26, %v1734_v51  ;;  %v782_v37 = vmul.f32 %v1450_v27, %v1734_v51  ;;  %v1405_v38 = vadd.f32 %v1404_v34, %v1403_v28  ;;  %v1453_v39 = vadd.f32 %v1452_v35, %v1451_v29 }
 0x11f   : > { %v1283_v40 = vpack.c.bf16 %v836_v32, %v835_v30  ;;  %v1323_v41 = vpack.c.bf16 %v852_v33, %v851_v31 }
 0x120   : > { %v805_v42 = vadd.f32 %v1739_v57, %v766_v36  ;;  %v821_v43 = vadd.f32 %v1739_v57, %v782_v37  ;;  %v767_v44 = vmul.f32 %v1405_v38, %v1734_v51  ;;  %v783_v45 = vmul.f32 %v1453_v39, %v1734_v51 }
 0x121   : > { %1347 = vst [vmem:[%s1753_s21 + $0x18] sm:$0xff] %v1283_v40   ;;  %1355 = vst [vmem:[%s1753_s21 + $0x58] sm:$0xff] %v1323_v41  }
 0x122   : > { %v806_v46 = vadd.f32 %v1739_v57, %v767_v44  ;;  %v822_v47 = vadd.f32 %v1739_v57, %v783_v45  ;;  %v1406_v48 = vpop.f32.mrb[20].mxu0  ;;  %v1454_v49 = vpop.f32.mrb[20].mxu1  ;;  %v837_v50 = vmax.f32 %v805_v42, 0.0  ;;  %v853_v52 = vmax.f32 %v821_v43, 0.0 }
 0x123   : > { %v1407_v53 = vpop.f32.mrb[21].mxu0  ;;  %v1455_v54 = vpop.f32.mrb[21].mxu1 }
 0x124   : > { %v838_v55 = vmax.f32 %v806_v46, 0.0  ;;  %v854_v56 = vmax.f32 %v822_v47, 0.0  ;;  %v1408_v58 = vadd.f32 %v1407_v53, %v1406_v48  ;;  %v1456_v59 = vadd.f32 %v1455_v54, %v1454_v49  ;;  %v1409_v60 = vpop.f32.mrb[22].mxu0  ;;  %v1457_v61 = vpop.f32.mrb[22].mxu1 }
 0x125   : > { %v1410_v62 = vpop.f32.mrb[23].mxu0  ;;  %v1458_v63 = vpop.f32.mrb[23].mxu1 }
 0x126   : > { %v1288_v0 = vpack.c.bf16 %v838_v55, %v837_v50  ;;  %v1328_v1 = vpack.c.bf16 %v854_v56, %v853_v52  ;;  %v768_v2 = vmul.f32 %v1408_v58, %v1734_v51  ;;  %v784_v3 = vmul.f32 %v1456_v59, %v1734_v51 }
 0x127   : > { %v1411_v4 = vadd.f32 %v1410_v62, %v1409_v60  ;;  %v1459_v5 = vadd.f32 %v1458_v63, %v1457_v61 }
 0x128   : > { %1348 = vst [vmem:[%s1753_s21 + $0x20] sm:$0xff] %v1288_v0   ;;  %1356 = vst [vmem:[%s1753_s21 + $0x60] sm:$0xff] %v1328_v1   ;;  %v807_v6 = vadd.f32 %v1739_v57, %v768_v2  ;;  %v823_v7 = vadd.f32 %v1739_v57, %v784_v3 }
 0x129   : > { %v769_v8 = vmul.f32 %v1411_v4, %v1734_v51  ;;  %v785_v9 = vmul.f32 %v1459_v5, %v1734_v51 }
 0x12a   : > { %v1412_v10 = vpop.f32.mrb[24].mxu0  ;;  %v1460_v11 = vpop.f32.mrb[24].mxu1  ;;  %v839_v20 = vmax.f32 %v807_v6, 0.0  ;;  %v855_v21 = vmax.f32 %v823_v7, 0.0 }
 0x12b   : > { %v808_v12 = vadd.f32 %v1739_v57, %v769_v8  ;;  %v824_v13 = vadd.f32 %v1739_v57, %v785_v9  ;;  %v1413_v14 = vpop.f32.mrb[25].mxu0  ;;  %v1461_v15 = vpop.f32.mrb[25].mxu1 }
 0x12c   : > { %v1414_v16 = vadd.f32 %v1413_v14, %v1412_v10  ;;  %v1462_v17 = vadd.f32 %v1461_v15, %v1460_v11  ;;  %v1415_v18 = vpop.f32.mrb[26].mxu0  ;;  %v1463_v19 = vpop.f32.mrb[26].mxu1 }
 0x12d   : > { %v840_v22 = vmax.f32 %v808_v12, 0.0  ;;  %v856_v23 = vmax.f32 %v824_v13, 0.0  ;;  %v1416_v24 = vpop.f32.mrb[27].mxu0  ;;  %v1464_v25 = vpop.f32.mrb[27].mxu1 }
 0x12e   : > { %v770_v26 = vmul.f32 %v1414_v16, %v1734_v51  ;;  %v786_v27 = vmul.f32 %v1462_v17, %v1734_v51  ;;  %v1417_v28 = vadd.f32 %v1416_v24, %v1415_v18  ;;  %v1465_v29 = vadd.f32 %v1464_v25, %v1463_v19 }
 0x12f   : > { %v1293_v30 = vpack.c.bf16 %v840_v22, %v839_v20  ;;  %v1333_v31 = vpack.c.bf16 %v856_v23, %v855_v21 }
 0x130   : > { %v809_v32 = vadd.f32 %v1739_v57, %v770_v26  ;;  %v825_v33 = vadd.f32 %v1739_v57, %v786_v27  ;;  %v771_v34 = vmul.f32 %v1417_v28, %v1734_v51  ;;  %v787_v35 = vmul.f32 %v1465_v29, %v1734_v51 }
 0x131   : > { %1349 = vst [vmem:[%s1753_s21 + $0x28] sm:$0xff] %v1293_v30   ;;  %1357 = vst [vmem:[%s1753_s21 + $0x68] sm:$0xff] %v1333_v31  }
 0x132   : > { %v810_v36 = vadd.f32 %v1739_v57, %v771_v34  ;;  %v826_v37 = vadd.f32 %v1739_v57, %v787_v35  ;;  %v1418_v38 = vpop.f32.mrb[28].mxu0  ;;  %v1466_v39 = vpop.f32.mrb[28].mxu1  ;;  %v841_v40 = vmax.f32 %v809_v32, 0.0  ;;  %v857_v41 = vmax.f32 %v825_v33, 0.0 }
 0x133   : > { %v1419_v42 = vpop.f32.mrb[29].mxu0  ;;  %v1467_v43 = vpop.f32.mrb[29].mxu1 }
 0x134   : > { %v842_v44 = vmax.f32 %v810_v36, 0.0  ;;  %v858_v45 = vmax.f32 %v826_v37, 0.0  ;;  %v1420_v46 = vadd.f32 %v1419_v42, %v1418_v38  ;;  %v1468_v47 = vadd.f32 %v1467_v43, %v1466_v39  ;;  %v1421_v48 = vpop.f32.mrb[30].mxu0  ;;  %v1469_v49 = vpop.f32.mrb[30].mxu1 }
 0x135   : > { %v1422_v50 = vpop.f32.mrb[31].mxu0  ;;  %v1470_v52 = vpop.f32.mrb[31].mxu1 }
 0x136   : > { %v1298_v53 = vpack.c.bf16 %v842_v44, %v841_v40  ;;  %v1338_v54 = vpack.c.bf16 %v858_v45, %v857_v41  ;;  %v772_v55 = vmul.f32 %v1420_v46, %v1734_v51  ;;  %v788_v56 = vmul.f32 %v1468_v47, %v1734_v51 }
 0x137   : > { %v1423_v58 = vadd.f32 %v1422_v50, %v1421_v48  ;;  %v1471_v59 = vadd.f32 %v1470_v52, %v1469_v49 }
 0x138   : > { %1350 = vst [vmem:[%s1753_s21 + $0x30] sm:$0xff] %v1298_v53   ;;  %1358 = vst [vmem:[%s1753_s21 + $0x70] sm:$0xff] %v1338_v54   ;;  %v811_v60 = vadd.f32 %v1739_v57, %v772_v55  ;;  %v827_v61 = vadd.f32 %v1739_v57, %v788_v56 }
 0x139   : > { %v773_v62 = vmul.f32 %v1423_v58, %v1734_v51  ;;  %v789_v63 = vmul.f32 %v1471_v59, %v1734_v51 }
 0x13a   : > { %v843_v2 = vmax.f32 %v811_v60, 0.0  ;;  %v859_v3 = vmax.f32 %v827_v61, 0.0 }
 0x13b   : > { %v812_v0 = vadd.f32 %v1739_v57, %v773_v62  ;;  %v828_v1 = vadd.f32 %v1739_v57, %v789_v63 }
 0x13d   : > { %v844_v4 = vmax.f32 %v812_v0, 0.0  ;;  %v860_v5 = vmax.f32 %v828_v1, 0.0 }
 0x13f   : > { %v1303_v6 = vpack.c.bf16 %v844_v4, %v843_v2  ;;  %v1343_v7 = vpack.c.bf16 %v860_v5, %v859_v3 }
 0x141   : > { %1351 = vst [vmem:[%s1753_s21 + $0x38] sm:$0xff] %v1303_v6   ;;  %1359 = vst [vmem:[%s1753_s21 + $0x78] sm:$0xff] %v1343_v7  }
 0x142 PF: > { %s14_s17 = sadd.s32 1, %s1598_s17   ;;  %s1841_s15 = smov %s1594_s16 }
 0x143   : > { %p11_p5 = scmp.ge.s32.totalorder %s14_s17, 10   ;;  %s1842_s16 = smov %s1844_s18 }
 0x145   :  { %13 = sbr.rel (!%p11_p5) target bundleno = 2 (0x2), region = 75 }

// kernel: stem_forward.3
= control target key start
LH: loop header
LB: loop body
LE: loop exit
PB: predicated region body
PF: predicated region fallthrough
CT: control target
= control target key end

     0   :  { %6 = vsyncpa [#allocation3], 0  ;;  %s2735_s0 = inlined_call_operand.vmem [shape: bf16[34,2,17,256], index: 0, kind: input, shape index: {}]   ;;  %s2736_s1 = inlined_call_operand.hbm [shape: bf16[32,16,128], index: 1, kind: output, shape index: {}]  }
   0x1   :  { %8 = vsyncpa [#allocation3 + $0x1], 0  ;;  %s1888_s6 = smov 0   ;;  %s1890_s7 = smov 0  }
   0x2   :  { %s1892_s8 = smov 0   ;;  %s1894_s9 = smov 0  }
   0x3 LB: > { %s1909_s10 = sadd.s32 4294967295, %s1873_s9   ;;  %s1644_s11 = sadd.s32 4294967294, %s1873_s9   ;;  %s1873_s9 = sphi %s1894_s9, %s2744_s9   ;;  %s1869_s8 = sphi %s1892_s8, %s2743_s8   ;;  %s1865_s7 = sphi %s1890_s7, %s2742_s7   ;;  %s1861_s6 = sphi %s1888_s6, %s2741_s6  }
   0x4   : > { %s1913_s12 = sadd.s32 1, %s1873_s9   ;;  %s47_s13 = sadd.s32 1, %s1869_s8 }
   0x5   : > { %s44_s14 = ssub.s32 %s1873_s9, %s1913_s12  ;;  %p57_p0 = scmp.ne.s32.totalorder %s1869_s8, %s1865_s7 }
   0x6   : > { %p45_p1 = scmp.eq.s32.totalorder %s44_s14, 0  ;;  %p58_p2 = scmp.eq.s32.totalorder %s1909_s10, 1 }
   0x7   : > { %p63_p3 = scmp.ne.s32.totalorder %s1865_s7, %s1861_s6  ;;  %p64_p4 = scmp.eq.s32.totalorder %s1644_s11, 1 }
   0x8   : > { %s1924_s15 = scalar_select %p45_p1, %s1869_s8, %s47_s13  }
   0x9   : > { %p1926_p5 = por %p58_p2, %p57_p0  ;;  %p1930_p6 = por %p64_p4, %p63_p3 }
   0xa   : > { %p1647_p7 = scmp.ge.s32.totalorder %s1873_s9, 1  ;;  %p92_p8 = scmp.lt.s32.totalorder %s1873_s9, 3 }
   0xc   : > { %p93_p9 = pnand %p1647_p7, %p92_p8 }
   0xd   : > { %s113_s18 = smul.u32 (!%p93_p9), 17, %s1909_s10  ;;  %vm348_vm0 = vsmask.f32 (!%p93_p9), 3328  ;;  %vm349_vm1 = vsmask.f32 (!%p93_p9), 7440  ;;  %s110_s23 = sand.u32 (!%p93_p9), 1, %s1865_s7  }
   0xe   : > { %96 = sbr.rel (%p93_p9) target bundleno = 264 (0x108), region = 24  ;;  %vm1964_vm2 = vmor (!%p93_p9), %vm348_vm0, %vm349_vm1  ;;  %s1648_s24 = sshll.u32 (!%p93_p9), %s110_s23, 7 }
   0xf   : > { %p114_p10 = scmp.lt.s32.totalorder (!%p93_p9), %s113_s18, 33  ;;  %s2054_s25 = scalar_lea.vmem (!%p93_p9), [#allocation2], %s1648_s24 }
  0x10   : > { %s1657_s26 = sshll.u32 (!%p93_p9), %s1909_s10, 11  ;;  %s1582_s27 = sshll.u32 (!%p93_p9), %s2054_s25, 4  ;;  %s2689_s27 = int_to_ptr.vmem [resolvable:$true] %s1582_s27 }
  0x11   : > { %s2687_s30 = scalar_lea.hbm (!%p93_p9), %s2736_s1, %s1657_s26  ;;  %s2694_s2 = scalar_lea.sflag (!%p93_p9), [#allocation3], %s110_s23 }
  0x12   : > { %s1811_s3 = scalar_lea.vmem (!%p93_p9), %s2689_s27, 2048  ;;  %s1875_s4 = smov (!%p93_p9), [#allocation2]  }
  0x13   : > { %p1812_p11 = scmp.ne.s32.totalorder (!%p93_p9), %s2689_s27, %s1811_s3  ;;  %s1815_s5 = sshll.u32 (!%p93_p9), %s1875_s4, 4  ;;  %s1816_s5 = int_to_ptr.vmem [resolvable:$false] %s1815_s5 }
  0x14   : > { %s1817_s10 = scalar_lea.vmem (!%p93_p9), %s1816_s5, 4096  ;;  %p1818_p0 = scmp.lt.s32.totalorder (!%p93_p9), %s2689_s27, %s1816_s5 }
  0x15   : > { %s2746_s18 = smov (!%p114_p10, %s113_s18), 33  ;;  %p1813_p12 = pnand %p1812_p11, %p1926_p5 }
  0x16   : > { %s1769_s19 = smul.u32 48, %s2746_s18  ;;  %p1819_p1 = scmp.lt.s32.totalorder %s1817_s10, %s1811_s3 }
  0x17   : > { %p1814_p13 = pneg %p1813_p12 }
  0x18   : > { %s1940_s22 = scalar_lea.vmem %s2735_s0, %s1769_s19  ;;  %p1820_p2 = por %p1819_p1, %p1818_p0 }
  0x19   : > { %v121_v0 = vld [vmem:[%s1940_s22] sm:$0xff]  ;;  %v122_v1 = vld [vmem:[%s1940_s22 + $0x8] sm:$0xff]  ;;  %v123_v4 = vld [vmem:[%s1940_s22 + $0x10] sm:$0x11] }
  0x1a   : > { %v252_v2 = vrot.slane %v121_v0, 4  ;;  %v253_v3 = vrot.slane %v122_v1, 4  ;;  %v1946_v5 = vld [vmem:[%s1940_s22 + $0x30] sm:$0xff]  ;;  %v1949_v6 = vld [vmem:[%s1940_s22 + $0x38] sm:$0xff]  ;;  %v352_v7 = vshrl.u32 %v121_v0, 16  ;;  %v355_v8 = vshll.u32 %v121_v0, 16  ;;  %p1821_p3 = pnand %p1820_p2, %p1814_p13 }
  0x1b   : > { %v254_v9 = vrot.slane %v1946_v5, 4  ;;  %v255_v10 = vrot.slane %v1949_v6, 4  ;;  %v361_v15 = vshll.u32 %v122_v1, 16  ;;  %v365_v16 = vshrl.u32 %v122_v1, 16  ;;  %v129_v17 = vld [vmem:[%s1940_s22 + $0x40] sm:$0x11] }
  0x1c   : > { %v316_v11 = vmax.bf16 %v252_v2, %v121_v0  ;;  %v317_v12 = vmax.bf16 %v253_v3, %v122_v1  ;;  %v354_v13 = vrot.slane %v352_v7, 4  ;;  %v357_v14 = vrot.slane %v355_v8, 5  ;;  %v124_v31 = vld [vmem:[%s1940_s22 + $0x18] sm:$0xff]  ;;  %v125_v32 = vld [vmem:[%s1940_s22 + $0x20] sm:$0xff]  ;;  %v130_v41 = vld [vmem:[%s1940_s22 + $0x48] sm:$0xff] }
  0x1d   : > { %v318_v18 = vmax.bf16 %v254_v9, %v1946_v5  ;;  %v319_v19 = vmax.bf16 %v255_v10, %v1949_v6  ;;  %v371_v20 = vshll.u32 %v123_v4, 16  ;;  %v376_v21 = vshrl.u32 %v1946_v5, 16  ;;  %v1974_v42 = vld [vmem:[%s1940_s22 + $0x50] sm:$0xff]  ;;  %v126_v59 = vld [vmem:[%s1940_s22 + $0x28] sm:$0x11] }
  0x1e   : > { %v358_v22 = vor.u32 %v357_v14, %v354_v13  ;;  %v363_v23 = vrot.slane %v361_v15, 5  ;;  %v367_v24 = vrot.slane %v365_v16, 4  ;;  %v379_v25 = vshll.u32 %v1946_v5, 16 }
  0x1f   : > { %v373_v27 = vrot.slane %v371_v20, 5  ;;  %v378_v28 = vrot.slane %v376_v21, 4  ;;  %v385_v29 = vshll.u32 %v1949_v6, 16  ;;  %v389_v30 = vshrl.u32 %v1949_v6, 16 }
  0x20   : > { %v359_v33 = vrot.slane %v358_v22, 4  ;;  %v368_v34 = vor.u32 %v367_v24, %v363_v23  ;;  %v381_v35 = vrot.slane %v379_v25, 5  ;;  %v395_v36 = vshll.u32 %v129_v17, 16  ;;  %v1997_v24 = vld [vmem:[%s1940_s22 + $0x60] sm:$0xff]  ;;  %v2000_v25 = vld [vmem:[%s1940_s22 + $0x68] sm:$0xff] }
  0x21   : > { %v387_v37 = vrot.slane %v385_v29, 5  ;;  %v391_v38 = vrot.slane %v389_v30, 4  ;;  %v863_v39 = vrot.slane %v124_v31, 4  ;;  %v864_v40 = vrot.slane %v125_v32, 4 }
  0x22   : > { %v364_v43 = vsel %vm1964_vm2, %v359_v33, %v363_v23  ;;  %v369_v44 = vrot.slane %v368_v34, 4  ;;  %v382_v45 = vor.u32 %v381_v35, %v378_v28  ;;  %v397_v46 = vrot.slane %v395_v36, 5  ;;  %v135_v36 = vld [vmem:[%s1940_s22 + $0x70] sm:$0x11] }
  0x23   : > { %v392_v47 = vor.u32 %v391_v38, %v387_v37  ;;  %v767_v48 = vmax.bf16 %v364_v43, %v316_v11  ;;  %v865_v49 = vrot.slane %v130_v41, 4  ;;  %v866_v50 = vrot.slane %v1974_v42, 4 }
  0x24   : > { %v374_v51 = vsel %vm1964_vm2, %v369_v44, %v373_v27  ;;  %v383_v52 = vrot.slane %v382_v45, 4  ;;  %v960_v53 = vshrl.u32 %v124_v31, 16  ;;  %v963_v54 = vshll.u32 %v124_v31, 16  ;;  %v136_v45 = vld [vmem:[%s1940_s22 + $0x78] sm:$0xff] }
  0x25   : > { %v393_v55 = vrot.slane %v392_v47, 4  ;;  %v768_v56 = vmax.bf16 %v374_v51, %v317_v12  ;;  %v799_v57 = vmax.bf16 %v767_v48, %v124_v31  ;;  %v969_v58 = vshll.u32 %v125_v32, 16 }
  0x26   : > { %v1984_v60 = vsel %vm1964_vm2, %v383_v52, %v387_v37  ;;  %v962_v61 = vrot.slane %v960_v53, 4  ;;  %v965_v62 = vrot.slane %v963_v54, 5  ;;  %v973_v63 = vshrl.u32 %v125_v32, 16  ;;  %v132_v52 = vld [vmem:[%s1940_s22 + $0x58] sm:$0x11]  ;;  %v2029_v53 = vld [vmem:[%s1940_s22 + $0x80] sm:$0xff] }
  0x27   : > { %v1988_v0 = vsel %vm1964_vm2, %v393_v55, %v397_v46  ;;  %v769_v1 = vmax.bf16 %v1984_v60, %v318_v18  ;;  %v800_v2 = vmax.bf16 %v768_v56, %v125_v32  ;;  %v927_v3 = vmax.bf16 %v863_v39, %v799_v57 }
  0x28   : > { %v770_v4 = vmax.bf16 %v1988_v0, %v319_v19  ;;  %v966_v7 = vor.u32 %v965_v62, %v962_v61  ;;  %v971_v8 = vrot.slane %v969_v58, 5  ;;  %v975_v11 = vrot.slane %v973_v63, 4 }
  0x29   : > { %v801_v12 = vmax.bf16 %v769_v1, %v130_v41  ;;  %v928_v13 = vmax.bf16 %v864_v40, %v800_v2  ;;  %v979_v14 = vshll.u32 %v126_v59, 16  ;;  %v984_v15 = vshrl.u32 %v130_v41, 16 }
  0x2a   : > { %v802_v16 = vmax.bf16 %v770_v4, %v1974_v42  ;;  %v967_v17 = vrot.slane %v966_v7, 4  ;;  %v976_v20 = vor.u32 %v975_v11, %v971_v8  ;;  %v987_v21 = vshll.u32 %v130_v41, 16 }
  0x2b   : > { %v1993_v18 = vmax.bf16 %v865_v49, %v801_v12  ;;  %v981_v22 = vrot.slane %v979_v14, 5  ;;  %v986_v23 = vrot.slane %v984_v15, 4  ;;  %v997_v19 = vshrl.u32 %v1974_v42, 16 }
  0x2c   : > { %v2002_v27 = vmax.bf16 %v866_v50, %v802_v16  ;;  %v972_v28 = vsel %vm1964_vm2, %v967_v17, %v971_v8  ;;  %v977_v29 = vrot.slane %v976_v20, 4  ;;  %v989_v30 = vrot.slane %v987_v21, 5 }
  0x2d   : > { %v999_v31 = vrot.slane %v997_v19, 4  ;;  %v1375_v32 = vmax.bf16 %v972_v28, %v927_v3  ;;  %v256_v33 = vrot.slane %v1997_v24, 4  ;;  %v257_v34 = vrot.slane %v2000_v25, 4 }
  0x2e   : > { %v982_v35 = vsel %vm1964_vm2, %v977_v29, %v981_v22  ;;  %v400_v37 = vshrl.u32 %v1997_v24, 16  ;;  %v403_v38 = vshll.u32 %v1997_v24, 16  ;;  %v409_v39 = vshll.u32 %v2000_v25, 16  ;;  %v2059_v29 = vld [vmem:[%s1940_s22 + $0x98] sm:$0xff] }
  0x2f   : > { %v1376_v40 = vmax.bf16 %v982_v35, %v928_v13  ;;  %v1407_v41 = vmax.bf16 %v1375_v32, %v1946_v5  ;;  %v320_v43 = vmax.bf16 %v256_v33, %v1997_v24  ;;  %v321_v44 = vmax.bf16 %v257_v34, %v2000_v25 }
  0x30   : > { %v402_v46 = vrot.slane %v400_v37, 4  ;;  %v405_v47 = vrot.slane %v403_v38, 5  ;;  %v411_v48 = vrot.slane %v409_v39, 5  ;;  %v413_v49 = vshrl.u32 %v2000_v25, 16  ;;  %v141_v39 = vld [vmem:[%s1940_s22 + $0xa0] sm:$0x11] }
  0x31   : > { %v1408_v50 = vmax.bf16 %v1376_v40, %v1949_v6  ;;  %v1445_v51 = vmax.bf16 %v1407_v41, %v254_v9  ;;  %v419_v54 = vshll.u32 %v135_v36, 16  ;;  %v867_v55 = vrot.slane %v136_v45, 4 }
  0x32   : > { %v406_v56 = vor.u32 %v405_v47, %v402_v46  ;;  %v415_v57 = vrot.slane %v413_v49, 4  ;;  %v868_v58 = vrot.slane %v2029_v53, 4  ;;  %v990_v59 = vor.u32 %v989_v30, %v986_v23  ;;  %v142_v47 = vld [vmem:[%s1940_s22 + $0xa8] sm:$0xff] }
  0x33   : > { %v1446_v61 = vmax.bf16 %v1408_v50, %v255_v10  ;;  %v1503_v62 = vmax.bf16 %v1445_v51, %v1984_v60  ;;  %v421_v63 = vrot.slane %v419_v54, 5  ;;  %v993_v5 = vshll.u32 %v1974_v42, 16  ;;  %v2084_v51 = vld [vmem:[%s1940_s22 + $0xb0] sm:$0xff] }
  0x34   : > { %v407_v9 = vrot.slane %v406_v56, 4  ;;  %v416_v1 = vor.u32 %v415_v57, %v411_v48  ;;  %v991_v2 = vrot.slane %v990_v59, 4  ;;  %v1003_v3 = vshll.u32 %v132_v52, 16 }
  0x35   : > { %v1504_v4 = vmax.bf16 %v1446_v61, %v1988_v0  ;;  %v995_v7 = vrot.slane %v993_v5, 5  ;;  %v1008_v8 = vshrl.u32 %v136_v45, 16  ;;  %v1011_v11 = vshll.u32 %v136_v45, 16  ;;  %v2048_v0 = vld [vmem:[%s1940_s22 + $0x90] sm:$0xff] }
  0x36   : > { %v2041_v12 = vsel %vm1964_vm2, %v407_v9, %v411_v48  ;;  %v417_v6 = vrot.slane %v416_v1, 4  ;;  %v1005_v10 = vrot.slane %v1003_v3, 5  ;;  %v1021_v60 = vshrl.u32 %v2029_v53, 16 }
  0x37   : > { %v1738_v42 = vcombine.low %v1503_v62, %v1504_v4  ;;  %v771_v13 = vmax.bf16 %v2041_v12, %v320_v43  ;;  %v996_v14 = vsel %vm1964_vm2, %v991_v2, %v995_v7  ;;  %v1000_v15 = vor.u32 %v999_v31, %v995_v7 }
  0x38   : > { %v422_v16 = vsel %vm1964_vm2, %v417_v6, %v421_v63  ;;  %v1010_v17 = vrot.slane %v1008_v8, 4  ;;  %v1013_v20 = vrot.slane %v1011_v11, 5  ;;  %v2052_v21 = vrot.slane %v1021_v60, 4  ;;  %v2098_v60 = vld [vmem:[%s1940_s22 + $0xc0] sm:$0xff] }
  0x39   : > { %1662 = vst [vmem:[%s2054_s25] sm:$0xff] %v1738_v42   ;;  %v772_v22 = vmax.bf16 %v422_v16, %v321_v44  ;;  %v803_v23 = vmax.bf16 %v771_v13, %v136_v45  ;;  %v1001_v19 = vrot.slane %v1000_v15, 4  ;;  %v1377_v28 = vmax.bf16 %v996_v14, %v1993_v18  ;;  %v2105_v15 = vld [vmem:[%s1940_s22 + $0xc8] sm:$0xff] }
  0x3a   : > { %v258_v30 = vrot.slane %v2048_v0, 4  ;;  %v259_v31 = vrot.slane %v2059_v29, 4  ;;  %v424_v32 = vshrl.u32 %v2048_v0, 16  ;;  %v427_v35 = vshll.u32 %v2048_v0, 16 }
  0x3b   : > { %v804_v36 = vmax.bf16 %v772_v22, %v2029_v53  ;;  %v931_v37 = vmax.bf16 %v867_v55, %v803_v23  ;;  %v1006_v38 = vsel %vm1964_vm2, %v1001_v19, %v1005_v10  ;;  %v1409_v18 = vmax.bf16 %v1377_v28, %v1997_v24 }
  0x3c   : > { %v1378_v40 = vmax.bf16 %v1006_v38, %v2002_v27  ;;  %v322_v41 = vmax.bf16 %v258_v30, %v2048_v0  ;;  %v323_v43 = vmax.bf16 %v259_v31, %v2059_v29  ;;  %v426_v44 = vrot.slane %v424_v32, 4  ;;  %v138_v27 = vld [vmem:[%s1940_s22 + $0x88] sm:$0x11]  ;;  %v147_v38 = vld [vmem:[%s1940_s22 + $0xd0] sm:$0x11] }
  0x3d   : > { %v932_v45 = vmax.bf16 %v868_v58, %v804_v36  ;;  %v1447_v46 = vmax.bf16 %v1409_v18, %v256_v33  ;;  %v429_v48 = vrot.slane %v427_v35, 5  ;;  %v433_v49 = vshll.u32 %v2059_v29, 16 }
  0x3e   : > { %v1410_v50 = vmax.bf16 %v1378_v40, %v2000_v25  ;;  %v437_v52 = vshrl.u32 %v2059_v29, 16  ;;  %v443_v54 = vshll.u32 %v141_v39, 16  ;;  %v869_v55 = vrot.slane %v142_v47, 4 }
  0x3f   : > { %v1505_v56 = vmax.bf16 %v1447_v46, %v2041_v12  ;;  %v430_v57 = vor.u32 %v429_v48, %v426_v44  ;;  %v435_v58 = vrot.slane %v433_v49, 5  ;;  %v870_v24 = vrot.slane %v2084_v51, 4 }
  0x40   : > { %v1448_v33 = vmax.bf16 %v1410_v50, %v257_v34  ;;  %v439_v59 = vrot.slane %v437_v52, 4  ;;  %v445_v61 = vrot.slane %v443_v54, 5  ;;  %v1014_v62 = vor.u32 %v1013_v20, %v1010_v17  ;;  %v144_v50 = vld [vmem:[%s1940_s22 + $0xb8] sm:$0x11] }
  0x41   : > { %v431_v63 = vrot.slane %v430_v57, 4  ;;  %v1017_v5 = vshll.u32 %v2029_v53, 16  ;;  %v1027_v9 = vshll.u32 %v138_v27, 16  ;;  %v1032_v1 = vshrl.u32 %v142_v47, 16  ;;  %v148_v27 = vld [vmem:[%s1940_s22 + $0xd8] sm:$0xff] }
  0x42   : > { %v1506_v2 = vmax.bf16 %v1448_v33, %v422_v16  ;;  %v440_v3 = vor.u32 %v439_v59, %v435_v58  ;;  %v1015_v4 = vrot.slane %v1014_v62, 4  ;;  %v1035_v7 = vshll.u32 %v142_v47, 16 }
  0x43   : > { %v2094_v8 = vsel %vm1964_vm2, %v431_v63, %v435_v58  ;;  %v1019_v25 = vrot.slane %v1017_v5, 5  ;;  %v1029_v34 = vrot.slane %v1027_v9, 5  ;;  %v1034_v11 = vrot.slane %v1032_v1, 4  ;;  %v2134_v58 = vld [vmem:[%s1940_s22 + $0xe0] sm:$0xff] }
  0x44   : > { %v1739_v12 = vcombine.low %v1505_v56, %v1506_v2  ;;  %v441_v6 = vrot.slane %v440_v3, 4  ;;  %v773_v10 = vmax.bf16 %v2094_v8, %v322_v41  ;;  %v1037_v53 = vrot.slane %v1035_v7, 5 }
  0x45   : > { %v1020_v42 = vsel %vm1964_vm2, %v1015_v4, %v1019_v25  ;;  %v1024_v13 = vor.u32 %v2052_v21, %v1019_v25  ;;  %v1045_v14 = vshrl.u32 %v2084_v51, 16  ;;  %v260_v16 = vrot.slane %v2098_v60, 4 }
  0x46   : > { %1740 = vst [vmem:[%s2054_s25 + $0x8] sm:$0xff] %v1739_v12   ;;  %v446_v17 = vsel %vm1964_vm2, %v441_v6, %v445_v61  ;;  %v805_v20 = vmax.bf16 %v773_v10, %v142_v47  ;;  %v1379_v22 = vmax.bf16 %v1020_v42, %v931_v37  ;;  %v261_v23 = vrot.slane %v2105_v15, 4 }
  0x47   : > { %v774_v19 = vmax.bf16 %v446_v17, %v323_v43  ;;  %v1025_v28 = vrot.slane %v1024_v13, 4  ;;  %v1047_v32 = vrot.slane %v1045_v14, 4  ;;  %v324_v21 = vmax.bf16 %v260_v16, %v2098_v60 }
  0x48   : > { %v933_v35 = vmax.bf16 %v869_v55, %v805_v20  ;;  %v1411_v36 = vmax.bf16 %v1379_v22, %v2048_v0  ;;  %v325_v18 = vmax.bf16 %v261_v23, %v2105_v15  ;;  %v448_v37 = vshrl.u32 %v2098_v60, 16  ;;  %v2157_v20 = vld [vmem:[%s1940_s22 + $0xf8] sm:$0xff] }
  0x49   : > { %v806_v39 = vmax.bf16 %v774_v19, %v2084_v51  ;;  %v1030_v40 = vsel %vm1964_vm2, %v1025_v28, %v1029_v34  ;;  %v451_v41 = vshll.u32 %v2098_v60, 16  ;;  %v457_v43 = vshll.u32 %v2105_v15, 16 }
  0x4a   : > { %v1380_v44 = vmax.bf16 %v1030_v40, %v932_v45  ;;  %v1449_v46 = vmax.bf16 %v1411_v36, %v258_v30  ;;  %v450_v47 = vrot.slane %v448_v37, 4  ;;  %v461_v48 = vshrl.u32 %v2105_v15, 16 }
  0x4b   : > { %v934_v49 = vmax.bf16 %v870_v24, %v806_v39  ;;  %v453_v52 = vrot.slane %v451_v41, 5  ;;  %v459_v54 = vrot.slane %v457_v43, 5  ;;  %v467_v55 = vshll.u32 %v147_v38, 16 }
  0x4c   : > { %v1412_v56 = vmax.bf16 %v1380_v44, %v2059_v29  ;;  %v1507_v57 = vmax.bf16 %v1449_v46, %v2094_v8  ;;  %v463_v33 = vrot.slane %v461_v48, 4  ;;  %v871_v45 = vrot.slane %v148_v27, 4 }
  0x4d   : > { %v454_v59 = vor.u32 %v453_v52, %v450_v47  ;;  %v469_v0 = vrot.slane %v467_v55, 5  ;;  %v872_v30 = vrot.slane %v2134_v58, 4  ;;  %v1038_v61 = vor.u32 %v1037_v53, %v1034_v11  ;;  %v150_v47 = vld [vmem:[%s1940_s22 + $0xe8] sm:$0x11]  ;;  %v2180_v52 = vld [vmem:[%s1940_s22 + $0x110] sm:$0xff] }
  0x4e   : > { %v1450_v24 = vmax.bf16 %v1412_v56, %v259_v31  ;;  %v464_v62 = vor.u32 %v463_v33, %v459_v54  ;;  %v1041_v63 = vshll.u32 %v2084_v51, 16  ;;  %v1051_v5 = vshll.u32 %v144_v50, 16  ;;  %v2146_v51 = vld [vmem:[%s1940_s22 + $0xf0] sm:$0xff] }
  0x4f   : > { %v455_v9 = vrot.slane %v454_v59, 4  ;;  %v1039_v1 = vrot.slane %v1038_v61, 4  ;;  %v1056_v2 = vshrl.u32 %v148_v27, 16  ;;  %v1059_v3 = vshll.u32 %v148_v27, 16 }
  0x50   : > { %v1508_v4 = vmax.bf16 %v1450_v24, %v446_v17  ;;  %v465_v7 = vrot.slane %v464_v62, 4  ;;  %v1043_v8 = vrot.slane %v1041_v63, 5  ;;  %v1053_v25 = vrot.slane %v1051_v5, 5 }
  0x51   : > { %v2142_v34 = vsel %vm1964_vm2, %v455_v9, %v459_v54  ;;  %v1058_v29 = vrot.slane %v1056_v2, 4  ;;  %v1061_v31 = vrot.slane %v1059_v3, 5  ;;  %v1069_v11 = vshrl.u32 %v2134_v58, 16 }
  0x52   : > { %v1741_v12 = vcombine.low %v1507_v57, %v1508_v4  ;;  %v2150_v6 = vsel %vm1964_vm2, %v465_v7, %v469_v0  ;;  %v775_v10 = vmax.bf16 %v2142_v34, %v324_v21  ;;  %v1044_v53 = vsel %vm1964_vm2, %v1039_v1, %v1043_v8 }
  0x53   : > { %v776_v42 = vmax.bf16 %v2150_v6, %v325_v18  ;;  %v1048_v13 = vor.u32 %v1047_v32, %v1043_v8  ;;  %v1071_v14 = vrot.slane %v1069_v11, 4  ;;  %v1381_v17 = vmax.bf16 %v1044_v53, %v933_v35  ;;  %v153_v18 = vld [vmem:[%s1940_s22 + $0x100] sm:$0x11] }
  0x54   : > { %1742 = vst [vmem:[%s2054_s25 + $0x10] sm:$0xff] %v1741_v12   ;;  %v807_v22 = vmax.bf16 %v775_v10, %v148_v27  ;;  %v262_v19 = vrot.slane %v2146_v51, 4  ;;  %v263_v28 = vrot.slane %v2157_v20, 4  ;;  %v472_v36 = vshrl.u32 %v2146_v51, 16  ;;  %v154_v27 = vld [vmem:[%s1940_s22 + $0x108] sm:$0xff]  ;;  %v2200_v11 = vld [vmem:[%s1940_s22 + $0x120] sm:$0xff] }
  0x55   : > { %v808_v21 = vmax.bf16 %v776_v42, %v2134_v58  ;;  %v1049_v38 = vrot.slane %v1048_v13, 4  ;;  %v1413_v32 = vmax.bf16 %v1381_v17, %v2098_v60  ;;  %v475_v35 = vshll.u32 %v2146_v51, 16 }
  0x56   : > { %v935_v37 = vmax.bf16 %v871_v45, %v807_v22  ;;  %v326_v39 = vmax.bf16 %v262_v19, %v2146_v51  ;;  %v327_v40 = vmax.bf16 %v263_v28, %v2157_v20  ;;  %v474_v41 = vrot.slane %v472_v36, 4  ;;  %v2205_v22 = vld [vmem:[%s1940_s22 + $0x128] sm:$0xff] }
  0x57   : > { %v936_v43 = vmax.bf16 %v872_v30, %v808_v21  ;;  %v1054_v44 = vsel %vm1964_vm2, %v1049_v38, %v1053_v25  ;;  %v1451_v46 = vmax.bf16 %v1413_v32, %v260_v16  ;;  %v477_v48 = vrot.slane %v475_v35, 5 }
  0x58   : > { %v1382_v50 = vmax.bf16 %v1054_v44, %v934_v49  ;;  %v481_v54 = vshll.u32 %v2157_v20, 16  ;;  %v485_v55 = vshrl.u32 %v2157_v20, 16  ;;  %v491_v56 = vshll.u32 %v153_v18, 16 }
  0x59   : > { %v1509_v57 = vmax.bf16 %v1451_v46, %v2142_v34  ;;  %v478_v33 = vor.u32 %v477_v48, %v474_v41  ;;  %v873_v45 = vrot.slane %v154_v27, 4  ;;  %v874_v59 = vrot.slane %v2180_v52, 4 }
  0x5a   : > { %v1414_v60 = vmax.bf16 %v1382_v50, %v2105_v15  ;;  %v483_v16 = vrot.slane %v481_v54, 5  ;;  %v487_v0 = vrot.slane %v485_v55, 4  ;;  %v493_v30 = vrot.slane %v491_v56, 5  ;;  %v160_v50 = vld [vmem:[%s1940_s22 + $0x138] sm:$0xff] }
  0x5b   : > { %v479_v49 = vrot.slane %v478_v33, 4  ;;  %v1062_v61 = vor.u32 %v1061_v31, %v1058_v29  ;;  %v1065_v24 = vshll.u32 %v2134_v58, 16  ;;  %v1075_v62 = vshll.u32 %v150_v47, 16  ;;  %v2232_v33 = vld [vmem:[%s1940_s22 + $0x140] sm:$0xff] }
  0x5c   : > { %v1452_v63 = vmax.bf16 %v1414_v60, %v261_v23  ;;  %v488_v5 = vor.u32 %v487_v0, %v483_v16  ;;  %v1080_v9 = vshrl.u32 %v154_v27, 16  ;;  %v1083_v1 = vshll.u32 %v154_v27, 16 }
  0x5d   : > { %v2192_v2 = vsel %vm1964_vm2, %v479_v49, %v483_v16  ;;  %v1063_v3 = vrot.slane %v1062_v61, 4  ;;  %v1067_v4 = vrot.slane %v1065_v24, 5  ;;  %v1077_v7 = vrot.slane %v1075_v62, 5 }
  0x5e   : > { %v1510_v8 = vmax.bf16 %v1452_v63, %v2150_v6  ;;  %v489_v25 = vrot.slane %v488_v5, 4  ;;  %v777_v58 = vmax.bf16 %v2192_v2, %v326_v39  ;;  %v1082_v15 = vrot.slane %v1080_v9, 4 }
  0x5f   : > { %v1068_v23 = vsel %vm1964_vm2, %v1063_v3, %v1067_v4  ;;  %v1072_v34 = vor.u32 %v1071_v14, %v1067_v4  ;;  %v1085_v29 = vrot.slane %v1083_v1, 5  ;;  %v1093_v31 = vshrl.u32 %v2180_v52, 16 }
  0x60   : > { %v1743_v12 = vcombine.low %v1509_v57, %v1510_v8  ;;  %v494_v6 = vsel %vm1964_vm2, %v489_v25, %v493_v30  ;;  %v809_v10 = vmax.bf16 %v777_v58, %v154_v27  ;;  %v1383_v53 = vmax.bf16 %v1068_v23, %v935_v37  ;;  %v159_v37 = vld [vmem:[%s1940_s22 + $0x130] sm:$0x11] }
  0x61   : > { %v778_v42 = vmax.bf16 %v494_v6, %v327_v40  ;;  %v1073_v13 = vrot.slane %v1072_v34, 4  ;;  %v1095_v17 = vrot.slane %v1093_v31, 4  ;;  %v264_v36 = vrot.slane %v2200_v11, 4 }
  0x62   : > { %1744 = vst [vmem:[%s2054_s25 + $0x18] sm:$0xff] %v1743_v12   ;;  %v937_v14 = vmax.bf16 %v873_v45, %v809_v10  ;;  %v1415_v21 = vmax.bf16 %v1383_v53, %v2146_v51  ;;  %v265_v38 = vrot.slane %v2205_v22, 4  ;;  %v496_v32 = vshrl.u32 %v2200_v11, 16  ;;  %v2253_v53 = vld [vmem:[%s1940_s22 + $0x158] sm:$0xff] }
  0x63   : > { %v810_v18 = vmax.bf16 %v778_v42, %v2180_v52  ;;  %v1078_v35 = vsel %vm1964_vm2, %v1073_v13, %v1077_v7  ;;  %v328_v39 = vmax.bf16 %v264_v36, %v2200_v11  ;;  %v499_v40 = vshll.u32 %v2200_v11, 16 }
  0x64   : > { %v1384_v41 = vmax.bf16 %v1078_v35, %v936_v43  ;;  %v1453_v44 = vmax.bf16 %v1415_v21, %v262_v19  ;;  %v329_v46 = vmax.bf16 %v265_v38, %v2205_v22  ;;  %v498_v47 = vrot.slane %v496_v32, 4  ;;  %v156_v43 = vld [vmem:[%s1940_s22 + $0x118] sm:$0x11] }
  0x65   : > { %v938_v48 = vmax.bf16 %v874_v59, %v810_v18  ;;  %v501_v27 = vrot.slane %v499_v40, 5  ;;  %v505_v54 = vshll.u32 %v2205_v22, 16  ;;  %v509_v55 = vshrl.u32 %v2205_v22, 16 }
  0x66   : > { %v1416_v56 = vmax.bf16 %v1384_v41, %v2157_v20  ;;  %v1511_v57 = vmax.bf16 %v1453_v44, %v2192_v2  ;;  %v515_v51 = vshll.u32 %v159_v37, 16  ;;  %v875_v19 = vrot.slane %v160_v50, 4  ;;  %v165_v37 = vld [vmem:[%s1940_s22 + $0x160] sm:$0x11] }
  0x67   : > { %v502_v45 = vor.u32 %v501_v27, %v498_v47  ;;  %v507_v60 = vrot.slane %v505_v54, 5  ;;  %v511_v16 = vrot.slane %v509_v55, 4  ;;  %v876_v59 = vrot.slane %v2232_v33, 4 }
  0x68   : > { %v1454_v0 = vmax.bf16 %v1416_v56, %v263_v28  ;;  %v517_v30 = vrot.slane %v515_v51, 5  ;;  %v1086_v49 = vor.u32 %v1085_v29, %v1082_v15  ;;  %v1089_v61 = vshll.u32 %v2180_v52, 16  ;;  %v2246_v15 = vld [vmem:[%s1940_s22 + $0x150] sm:$0xff] }
  0x69   : > { %v503_v24 = vrot.slane %v502_v45, 4  ;;  %v512_v62 = vor.u32 %v511_v16, %v507_v60  ;;  %v1099_v63 = vshll.u32 %v156_v43, 16  ;;  %v1104_v5 = vshrl.u32 %v160_v50, 16 }
  0x6a   : > { %v1512_v9 = vmax.bf16 %v1454_v0, %v494_v6  ;;  %v1087_v1 = vrot.slane %v1086_v49, 4  ;;  %v1091_v2 = vrot.slane %v1089_v61, 5  ;;  %v1107_v3 = vshll.u32 %v160_v50, 16 }
  0x6b   : > { %v2240_v4 = vsel %vm1964_vm2, %v503_v24, %v507_v60  ;;  %v513_v20 = vrot.slane %v512_v62, 4  ;;  %v1101_v28 = vrot.slane %v1099_v63, 5  ;;  %v1106_v7 = vrot.slane %v1104_v5, 4 }
  0x6c   : > { %v1745_v8 = vcombine.low %v1511_v57, %v1512_v9  ;;  %v779_v52 = vmax.bf16 %v2240_v4, %v328_v39  ;;  %v1092_v25 = vsel %vm1964_vm2, %v1087_v1, %v1091_v2  ;;  %v1096_v58 = vor.u32 %v1095_v17, %v1091_v2  ;;  %v162_v57 = vld [vmem:[%s1940_s22 + $0x148] sm:$0x11] }
  0x6d   : > { %v518_v23 = vsel %vm1964_vm2, %v513_v20, %v517_v30  ;;  %v1109_v34 = vrot.slane %v1107_v3, 5  ;;  %v1117_v29 = vshrl.u32 %v2232_v33, 16  ;;  %v1385_v31 = vmax.bf16 %v1092_v25, %v937_v14 }
  0x6e   : > { %1746 = vst [vmem:[%s2054_s25 + $0x20] sm:$0xff] %v1745_v8   ;;  %v780_v12 = vmax.bf16 %v518_v23, %v329_v46  ;;  %v811_v6 = vmax.bf16 %v779_v52, %v160_v50  ;;  %v1097_v10 = vrot.slane %v1096_v58, 4  ;;  %v266_v42 = vrot.slane %v2246_v15, 4  ;;  %v166_v50 = vld [vmem:[%s1940_s22 + $0x168] sm:$0xff] }
  0x6f   : > { %v1119_v13 = vrot.slane %v1117_v29, 4  ;;  %v1417_v17 = vmax.bf16 %v1385_v31, %v2200_v11  ;;  %v267_v21 = vrot.slane %v2253_v53, 4  ;;  %v520_v32 = vshrl.u32 %v2246_v15, 16  ;;  %v2279_v11 = vld [vmem:[%s1940_s22 + $0x170] sm:$0xff]  ;;  %v2297_v31 = vld [vmem:[%s1940_s22 + $0x188] sm:$0xff] }
  0x70   : > { %v812_v18 = vmax.bf16 %v780_v12, %v2232_v33  ;;  %v939_v14 = vmax.bf16 %v875_v19, %v811_v6  ;;  %v1102_v35 = vsel %vm1964_vm2, %v1097_v10, %v1101_v28  ;;  %v330_v39 = vmax.bf16 %v266_v42, %v2246_v15 }
  0x71   : > { %v1386_v40 = vmax.bf16 %v1102_v35, %v938_v48  ;;  %v1455_v41 = vmax.bf16 %v1417_v17, %v264_v36  ;;  %v331_v44 = vmax.bf16 %v267_v21, %v2253_v53  ;;  %v522_v46 = vrot.slane %v520_v32, 4  ;;  %v171_v35 = vld [vmem:[%s1940_s22 + $0x190] sm:$0x11] }
  0x72   : > { %v940_v47 = vmax.bf16 %v876_v59, %v812_v18  ;;  %v523_v27 = vshll.u32 %v2246_v15, 16  ;;  %v529_v54 = vshll.u32 %v2253_v53, 16  ;;  %v533_v55 = vshrl.u32 %v2253_v53, 16 }
  0x73   : > { %v1418_v56 = vmax.bf16 %v1386_v40, %v2205_v22  ;;  %v1513_v48 = vmax.bf16 %v1455_v41, %v2240_v4  ;;  %v539_v36 = vshll.u32 %v165_v37, 16  ;;  %v877_v43 = vrot.slane %v166_v50, 4 }
  0x74   : > { %v525_v51 = vrot.slane %v523_v27, 5  ;;  %v531_v19 = vrot.slane %v529_v54, 5  ;;  %v535_v45 = vrot.slane %v533_v55, 4  ;;  %v878_v60 = vrot.slane %v2279_v11, 4 }
  0x75   : > { %v1456_v16 = vmax.bf16 %v1418_v56, %v265_v38  ;;  %v541_v59 = vrot.slane %v539_v36, 5  ;;  %v1110_v0 = vor.u32 %v1109_v34, %v1106_v7  ;;  %v1113_v30 = vshll.u32 %v2232_v33, 16  ;;  %v2288_v7 = vld [vmem:[%s1940_s22 + $0x180] sm:$0xff] }
  0x76   : > { %v526_v49 = vor.u32 %v525_v51, %v522_v46  ;;  %v536_v61 = vor.u32 %v535_v45, %v531_v19  ;;  %v1123_v24 = vshll.u32 %v162_v57, 16  ;;  %v1128_v62 = vshrl.u32 %v166_v50, 16  ;;  %v172_v57 = vld [vmem:[%s1940_s22 + $0x198] sm:$0xff] }
  0x77   : > { %v1514_v63 = vmax.bf16 %v1456_v16, %v518_v23  ;;  %v1111_v5 = vrot.slane %v1110_v0, 4  ;;  %v1115_v9 = vrot.slane %v1113_v30, 5  ;;  %v1131_v1 = vshll.u32 %v166_v50, 16 }
  0x78   : > { %v527_v2 = vrot.slane %v526_v49, 4  ;;  %v537_v3 = vrot.slane %v536_v61, 4  ;;  %v1125_v4 = vrot.slane %v1123_v24, 5  ;;  %v1130_v22 = vrot.slane %v1128_v62, 4 }
  0x79   : > { %v1747_v38 = vcombine.low %v1513_v48, %v1514_v63  ;;  %v1116_v20 = vsel %vm1964_vm2, %v1111_v5, %v1115_v9  ;;  %v1120_v33 = vor.u32 %v1119_v13, %v1115_v9  ;;  %v1133_v28 = vrot.slane %v1131_v1, 5  ;;  %v168_v48 = vld [vmem:[%s1940_s22 + $0x178] sm:$0x11] }
  0x7a   : > { %v532_v8 = vsel %vm1964_vm2, %v527_v2, %v531_v19  ;;  %v542_v52 = vsel %vm1964_vm2, %v537_v3, %v541_v59  ;;  %v1141_v25 = vshrl.u32 %v2279_v11, 16  ;;  %v1387_v58 = vmax.bf16 %v1116_v20, %v939_v14 }
  0x7b   : > { %1748 = vst [vmem:[%s2054_s25 + $0x28] sm:$0xff] %v1747_v38   ;;  %v781_v23 = vmax.bf16 %v532_v8, %v330_v39  ;;  %v782_v34 = vmax.bf16 %v542_v52, %v331_v44  ;;  %v1121_v29 = vrot.slane %v1120_v33, 4  ;;  %v268_v12 = vrot.slane %v2288_v7, 4  ;;  %v2330_v38 = vld [vmem:[%s1940_s22 + $0x1b0] sm:$0xff] }
  0x7c   : > { %v1143_v6 = vrot.slane %v1141_v25, 4  ;;  %v1419_v10 = vmax.bf16 %v1387_v58, %v2246_v15  ;;  %v269_v13 = vrot.slane %v2297_v31, 4  ;;  %v544_v17 = vshrl.u32 %v2288_v7, 16 }
  0x7d   : > { %v813_v32 = vmax.bf16 %v781_v23, %v166_v50  ;;  %v814_v18 = vmax.bf16 %v782_v34, %v2279_v11  ;;  %v1126_v14 = vsel %vm1964_vm2, %v1121_v29, %v1125_v4  ;;  %v332_v37 = vmax.bf16 %v268_v12, %v2288_v7  ;;  %v2343_v23 = vld [vmem:[%s1940_s22 + $0x1b8] sm:$0xff] }
  0x7e   : > { %v1388_v39 = vmax.bf16 %v1126_v14, %v940_v47  ;;  %v1457_v40 = vmax.bf16 %v1419_v10, %v266_v42  ;;  %v333_v41 = vmax.bf16 %v269_v13, %v2297_v31  ;;  %v546_v44 = vrot.slane %v544_v17, 4  ;;  %v2321_v47 = vld [vmem:[%s1940_s22 + $0x1a0] sm:$0xff] }
  0x7f   : > { %v941_v46 = vmax.bf16 %v877_v43, %v813_v32  ;;  %v942_v50 = vmax.bf16 %v878_v60, %v814_v18  ;;  %v547_v27 = vshll.u32 %v2288_v7, 16  ;;  %v553_v54 = vshll.u32 %v2297_v31, 16 }
  0x80   : > { %v1420_v55 = vmax.bf16 %v1388_v39, %v2253_v53  ;;  %v1515_v56 = vmax.bf16 %v1457_v40, %v532_v8  ;;  %v557_v15 = vshrl.u32 %v2297_v31, 16  ;;  %v563_v42 = vshll.u32 %v171_v35, 16  ;;  %v177_v39 = vld [vmem:[%s1940_s22 + $0x1c0] sm:$0x11] }
  0x81   : > { %v549_v36 = vrot.slane %v547_v27, 5  ;;  %v555_v51 = vrot.slane %v553_v54, 5  ;;  %v879_v19 = vrot.slane %v172_v57, 4  ;;  %v880_v43 = vrot.slane %v2321_v47, 4 }
  0x82   : > { %v1458_v45 = vmax.bf16 %v1420_v55, %v267_v21  ;;  %v559_v60 = vrot.slane %v557_v15, 4  ;;  %v565_v16 = vrot.slane %v563_v42, 5  ;;  %v1134_v59 = vor.u32 %v1133_v28, %v1130_v22 }
  0x83   : > { %v550_v0 = vor.u32 %v549_v36, %v546_v44  ;;  %v1137_v30 = vshll.u32 %v2279_v11, 16  ;;  %v1147_v49 = vshll.u32 %v168_v48, 16  ;;  %v1152_v61 = vshrl.u32 %v172_v57, 16  ;;  %v178_v48 = vld [vmem:[%s1940_s22 + $0x1c8] sm:$0xff] }
  0x84   : > { %v1516_v24 = vmax.bf16 %v1458_v45, %v542_v52  ;;  %v560_v62 = vor.u32 %v559_v60, %v555_v51  ;;  %v1135_v63 = vrot.slane %v1134_v59, 4  ;;  %v1155_v5 = vshll.u32 %v172_v57, 16  ;;  %v2367_v45 = vld [vmem:[%s1940_s22 + $0x1d0] sm:$0xff] }
  0x85   : > { %v551_v9 = vrot.slane %v550_v0, 4  ;;  %v1139_v1 = vrot.slane %v1137_v30, 5  ;;  %v1149_v2 = vrot.slane %v1147_v49, 5  ;;  %v1154_v53 = vrot.slane %v1152_v61, 4 }
  0x86   : > { %v1749_v21 = vcombine.low %v1515_v56, %v1516_v24  ;;  %v561_v3 = vrot.slane %v560_v62, 4  ;;  %v1157_v4 = vrot.slane %v1155_v5, 5  ;;  %v1165_v22 = vshrl.u32 %v2321_v47, 16  ;;  %v174_v56 = vld [vmem:[%s1940_s22 + $0x1a8] sm:$0x11] }
  0x87   : > { %v556_v11 = vsel %vm1964_vm2, %v551_v9, %v555_v51  ;;  %v1140_v20 = vsel %vm1964_vm2, %v1135_v63, %v1139_v1  ;;  %v1144_v33 = vor.u32 %v1143_v6, %v1139_v1  ;;  %v270_v28 = vrot.slane %v2330_v38, 4 }
  0x88   : > { %1750 = vst [vmem:[%s2054_s25 + $0x30] sm:$0xff] %v1749_v21   ;;  %v566_v8 = vsel %vm1964_vm2, %v561_v3, %v565_v16  ;;  %v783_v52 = vmax.bf16 %v556_v11, %v332_v37  ;;  %v2340_v25 = vrot.slane %v1165_v22, 4  ;;  %v1389_v58 = vmax.bf16 %v1140_v20, %v941_v46  ;;  %v2383_v22 = vld [vmem:[%s1940_s22 + $0x1e0] sm:$0xff] }
  0x89   : > { %v784_v34 = vmax.bf16 %v566_v8, %v333_v41  ;;  %v1145_v29 = vrot.slane %v1144_v33, 4  ;;  %v271_v10 = vrot.slane %v2343_v23, 4  ;;  %v334_v6 = vmax.bf16 %v270_v28, %v2330_v38 }
  0x8a   : > { %v815_v17 = vmax.bf16 %v783_v52, %v172_v57  ;;  %v1421_v32 = vmax.bf16 %v1389_v58, %v2288_v7  ;;  %v568_v18 = vshrl.u32 %v2330_v38, 16  ;;  %v571_v14 = vshll.u32 %v2330_v38, 16 }
  0x8b   : > { %v816_v35 = vmax.bf16 %v784_v34, %v2321_v47  ;;  %v1150_v37 = vsel %vm1964_vm2, %v1145_v29, %v1149_v2  ;;  %v335_v40 = vmax.bf16 %v271_v10, %v2343_v23  ;;  %v577_v41 = vshll.u32 %v2343_v23, 16  ;;  %v2391_v29 = vld [vmem:[%s1940_s22 + $0x1e8] sm:$0xff] }
  0x8c   : > { %v943_v44 = vmax.bf16 %v879_v19, %v815_v17  ;;  %v1390_v46 = vmax.bf16 %v1150_v37, %v942_v50  ;;  %v1459_v27 = vmax.bf16 %v1421_v32, %v268_v12  ;;  %v570_v54 = vrot.slane %v568_v18, 4 }
  0x8d   : > { %v944_v55 = vmax.bf16 %v880_v43, %v816_v35  ;;  %v573_v57 = vrot.slane %v571_v14, 5  ;;  %v579_v15 = vrot.slane %v577_v41, 5  ;;  %v581_v42 = vshrl.u32 %v2343_v23, 16 }
  0x8e   : > { %v1422_v36 = vmax.bf16 %v1390_v46, %v2297_v31  ;;  %v1517_v51 = vmax.bf16 %v1459_v27, %v556_v11  ;;  %v587_v60 = vshll.u32 %v177_v39, 16  ;;  %v881_v16 = vrot.slane %v178_v48, 4  ;;  %v183_v39 = vld [vmem:[%s1940_s22 + $0x1f0] sm:$0x11] }
  0x8f   : > { %v574_v19 = vor.u32 %v573_v57, %v570_v54  ;;  %v583_v50 = vrot.slane %v581_v42, 4  ;;  %v882_v7 = vrot.slane %v2367_v45, 4  ;;  %v1158_v12 = vor.u32 %v1157_v4, %v1154_v53 }
  0x90   : > { %v1460_v43 = vmax.bf16 %v1422_v36, %v269_v13  ;;  %v589_v59 = vrot.slane %v587_v60, 5  ;;  %v1161_v0 = vshll.u32 %v2321_v47, 16  ;;  %v1171_v30 = vshll.u32 %v174_v56, 16  ;;  %v184_v56 = vld [vmem:[%s1940_s22 + $0x1f8] sm:$0xff] }
  0x91   : > { %v575_v49 = vrot.slane %v574_v19, 4  ;;  %v584_v61 = vor.u32 %v583_v50, %v579_v15  ;;  %v1159_v24 = vrot.slane %v1158_v12, 4  ;;  %v1176_v62 = vshrl.u32 %v178_v48, 16 }
  0x92   : > { %v1518_v63 = vmax.bf16 %v1460_v43, %v566_v8  ;;  %v1163_v5 = vrot.slane %v1161_v0, 5  ;;  %v1173_v9 = vrot.slane %v1171_v30, 5  ;;  %v1179_v1 = vshll.u32 %v178_v48, 16 }
  0x93   : > { %v2375_v2 = vsel %vm1964_vm2, %v575_v49, %v579_v15  ;;  %v585_v31 = vrot.slane %v584_v61, 4  ;;  %v1178_v13 = vrot.slane %v1176_v62, 4  ;;  %v1189_v47 = vshrl.u32 %v2367_v45, 16 }
  0x94   : > { %v1751_v53 = vcombine.low %v1517_v51, %v1518_v63  ;;  %v785_v21 = vmax.bf16 %v2375_v2, %v334_v6  ;;  %v1164_v3 = vsel %vm1964_vm2, %v1159_v24, %v1163_v5  ;;  %v1168_v4 = vor.u32 %v2340_v25, %v1163_v5  ;;  %v2417_v51 = vld [vmem:[%s1940_s22 + $0x200] sm:$0xff] }
  0x95   : > { %v590_v11 = vsel %vm1964_vm2, %v585_v31, %v589_v59  ;;  %v1181_v20 = vrot.slane %v1179_v1, 5  ;;  %v2387_v33 = vrot.slane %v1189_v47, 4  ;;  %v1391_v8 = vmax.bf16 %v1164_v3, %v943_v44  ;;  %v2432_v47 = vld [vmem:[%s1940_s22 + $0x210] sm:$0xff] }
  0x96   : > { %1752 = vst [vmem:[%s2054_s25 + $0x38] sm:$0xff] %v1751_v53   ;;  %v786_v52 = vmax.bf16 %v590_v11, %v335_v40  ;;  %v817_v58 = vmax.bf16 %v785_v21, %v178_v48  ;;  %v1169_v34 = vrot.slane %v1168_v4, 4  ;;  %v272_v6 = vrot.slane %v2383_v22, 4 }
  0x97   : > { %v1423_v25 = vmax.bf16 %v1391_v8, %v2330_v38  ;;  %v273_v17 = vrot.slane %v2391_v29, 4  ;;  %v592_v32 = vshrl.u32 %v2383_v22, 16  ;;  %v595_v18 = vshll.u32 %v2383_v22, 16 }
  0x98   : > { %v818_v14 = vmax.bf16 %v786_v52, %v2367_v45  ;;  %v945_v35 = vmax.bf16 %v881_v16, %v817_v58  ;;  %v1174_v37 = vsel %vm1964_vm2, %v1169_v34, %v1173_v9  ;;  %v336_v40 = vmax.bf16 %v272_v6, %v2383_v22  ;;  %v2439_v52 = vld [vmem:[%s1940_s22 + $0x218] sm:$0xff] }
  0x99   : > { %v1392_v41 = vmax.bf16 %v1174_v37, %v944_v55  ;;  %v1461_v44 = vmax.bf16 %v1423_v25, %v270_v28  ;;  %v337_v46 = vmax.bf16 %v273_v17, %v2391_v29  ;;  %v594_v27 = vrot.slane %v592_v32, 4  ;;  %v180_v55 = vld [vmem:[%s1940_s22 + $0x1d8] sm:$0x11]  ;;  %v189_v37 = vld [vmem:[%s1940_s22 + $0x220] sm:$0x11] }
  0x9a   : > { %v946_v54 = vmax.bf16 %v882_v7, %v818_v14  ;;  %v597_v48 = vrot.slane %v595_v18, 5  ;;  %v601_v57 = vshll.u32 %v2391_v29, 16  ;;  %v605_v15 = vshrl.u32 %v2391_v29, 16 }
  0x9b   : > { %v1424_v42 = vmax.bf16 %v1392_v41, %v2343_v23  ;;  %v1519_v36 = vmax.bf16 %v1461_v44, %v2375_v2  ;;  %v611_v38 = vshll.u32 %v183_v39, 16  ;;  %v883_v28 = vrot.slane %v184_v56, 4 }
  0x9c   : > { %v598_v60 = vor.u32 %v597_v48, %v594_v27  ;;  %v603_v16 = vrot.slane %v601_v57, 5  ;;  %v607_v19 = vrot.slane %v605_v15, 4  ;;  %v884_v50 = vrot.slane %v2417_v51, 4 }
  0x9d   : > { %v1462_v7 = vmax.bf16 %v1424_v42, %v271_v10  ;;  %v613_v12 = vrot.slane %v611_v38, 5  ;;  %v1182_v43 = vor.u32 %v1181_v20, %v1178_v13  ;;  %v1185_v59 = vshll.u32 %v2367_v45, 16 }
  0x9e   : > { %v599_v0 = vrot.slane %v598_v60, 4  ;;  %v608_v30 = vor.u32 %v607_v19, %v603_v16  ;;  %v1195_v49 = vshll.u32 %v180_v55, 16  ;;  %v1200_v61 = vshrl.u32 %v184_v56, 16 }
  0x9f   : > { %v1520_v24 = vmax.bf16 %v1462_v7, %v590_v11  ;;  %v1183_v62 = vrot.slane %v1182_v43, 4  ;;  %v1187_v63 = vrot.slane %v1185_v59, 5  ;;  %v1203_v5 = vshll.u32 %v184_v56, 16 }
  0xa0   : > { %v2425_v9 = vsel %vm1964_vm2, %v599_v0, %v603_v16  ;;  %v609_v23 = vrot.slane %v608_v30, 4  ;;  %v1197_v10 = vrot.slane %v1195_v49, 5  ;;  %v1202_v1 = vrot.slane %v1200_v61, 4 }
  0xa1   : > { %v1753_v2 = vcombine.low %v1519_v36, %v1520_v24  ;;  %v787_v45 = vmax.bf16 %v2425_v9, %v336_v40  ;;  %v1188_v31 = vsel %vm1964_vm2, %v1183_v62, %v1187_v63  ;;  %v1192_v13 = vor.u32 %v2387_v33, %v1187_v63  ;;  %v186_v36 = vld [vmem:[%s1940_s22 + $0x208] sm:$0x11] }
  0xa2   : > { %v614_v53 = vsel %vm1964_vm2, %v609_v23, %v613_v12  ;;  %v1205_v21 = vrot.slane %v1203_v5, 5  ;;  %v1213_v3 = vshrl.u32 %v2417_v51, 16  ;;  %v1393_v4 = vmax.bf16 %v1188_v31, %v945_v35 }
  0xa3   : > { %1754 = vst [vmem:[%s2054_s25 + $0x40] sm:$0xff] %v1753_v2   ;;  %v788_v11 = vmax.bf16 %v614_v53, %v337_v46  ;;  %v819_v20 = vmax.bf16 %v787_v45, %v184_v56  ;;  %v1193_v8 = vrot.slane %v1192_v13, 4  ;;  %v274_v58 = vrot.slane %v2432_v47, 4  ;;  %v190_v56 = vld [vmem:[%s1940_s22 + $0x228] sm:$0xff] }
  0xa4   : > { %v1215_v33 = vrot.slane %v1213_v3, 4  ;;  %v1425_v34 = vmax.bf16 %v1393_v4, %v2383_v22  ;;  %v275_v25 = vrot.slane %v2439_v52, 4  ;;  %v616_v32 = vshrl.u32 %v2432_v47, 16  ;;  %v2465_v22 = vld [vmem:[%s1940_s22 + $0x230] sm:$0xff]  ;;  %v2483_v4 = vld [vmem:[%s1940_s22 + $0x248] sm:$0xff] }
  0xa5   : > { %v820_v18 = vmax.bf16 %v788_v11, %v2417_v51  ;;  %v947_v14 = vmax.bf16 %v883_v28, %v819_v20  ;;  %v1198_v35 = vsel %vm1964_vm2, %v1193_v8, %v1197_v10  ;;  %v338_v39 = vmax.bf16 %v274_v58, %v2432_v47 }
  0xa6   : > { %v1394_v40 = vmax.bf16 %v1198_v35, %v946_v54  ;;  %v1463_v41 = vmax.bf16 %v1425_v34, %v272_v6  ;;  %v339_v44 = vmax.bf16 %v275_v25, %v2439_v52  ;;  %v618_v46 = vrot.slane %v616_v32, 4  ;;  %v195_v35 = vld [vmem:[%s1940_s22 + $0x250] sm:$0x11] }
  0xa7   : > { %v948_v27 = vmax.bf16 %v884_v50, %v820_v18  ;;  %v619_v48 = vshll.u32 %v2432_v47, 16  ;;  %v625_v57 = vshll.u32 %v2439_v52, 16  ;;  %v629_v15 = vshrl.u32 %v2439_v52, 16 }
  0xa8   : > { %v1426_v42 = vmax.bf16 %v1394_v40, %v2391_v29  ;;  %v1521_v54 = vmax.bf16 %v1463_v41, %v2425_v9  ;;  %v635_v6 = vshll.u32 %v189_v37, 16  ;;  %v885_v55 = vrot.slane %v190_v56, 4 }
  0xa9   : > { %v621_v38 = vrot.slane %v619_v48, 5  ;;  %v627_v28 = vrot.slane %v625_v57, 5  ;;  %v631_v60 = vrot.slane %v629_v15, 4  ;;  %v886_v16 = vrot.slane %v2465_v22, 4 }
  0xaa   : > { %v1464_v19 = vmax.bf16 %v1426_v42, %v273_v17  ;;  %v637_v50 = vrot.slane %v635_v6, 5  ;;  %v1206_v7 = vor.u32 %v1205_v21, %v1202_v1  ;;  %v1209_v12 = vshll.u32 %v2417_v51, 16  ;;  %v2474_v1 = vld [vmem:[%s1940_s22 + $0x240] sm:$0xff] }
  0xab   : > { %v622_v43 = vor.u32 %v621_v38, %v618_v46  ;;  %v632_v59 = vor.u32 %v631_v60, %v627_v28  ;;  %v1219_v0 = vshll.u32 %v186_v36, 16  ;;  %v1224_v30 = vshrl.u32 %v190_v56, 16  ;;  %v196_v36 = vld [vmem:[%s1940_s22 + $0x258] sm:$0xff] }
  0xac   : > { %v1522_v49 = vmax.bf16 %v1464_v19, %v614_v53  ;;  %v1207_v61 = vrot.slane %v1206_v7, 4  ;;  %v1211_v24 = vrot.slane %v1209_v12, 5  ;;  %v1227_v62 = vshll.u32 %v190_v56, 16 }
  0xad   : > { %v623_v63 = vrot.slane %v622_v43, 4  ;;  %v633_v5 = vrot.slane %v632_v59, 4  ;;  %v1221_v9 = vrot.slane %v1219_v0, 5  ;;  %v1226_v29 = vrot.slane %v1224_v30, 4 }
  0xae   : > { %v1755_v17 = vcombine.low %v1521_v54, %v1522_v49  ;;  %v1212_v23 = vsel %vm1964_vm2, %v1207_v61, %v1211_v24  ;;  %v1216_v51 = vor.u32 %v1215_v33, %v1211_v24  ;;  %v1229_v10 = vrot.slane %v1227_v62, 5  ;;  %v192_v54 = vld [vmem:[%s1940_s22 + $0x238] sm:$0x11] }
  0xaf   : > { %v628_v2 = vsel %vm1964_vm2, %v623_v63, %v627_v28  ;;  %v638_v45 = vsel %vm1964_vm2, %v633_v5, %v637_v50  ;;  %v1237_v31 = vshrl.u32 %v2465_v22, 16  ;;  %v1395_v13 = vmax.bf16 %v1212_v23, %v947_v14 }
  0xb0   : > { %1756 = vst [vmem:[%s2054_s25 + $0x48] sm:$0xff] %v1755_v17   ;;  %v789_v53 = vmax.bf16 %v628_v2, %v338_v39  ;;  %v790_v21 = vmax.bf16 %v638_v45, %v339_v44  ;;  %v1217_v3 = vrot.slane %v1216_v51, 4  ;;  %v276_v11 = vrot.slane %v2474_v1, 4  ;;  %v2516_v17 = vld [vmem:[%s1940_s22 + $0x270] sm:$0xff] }
  0xb1   : > { %v1239_v20 = vrot.slane %v1237_v31, 4  ;;  %v1427_v8 = vmax.bf16 %v1395_v13, %v2432_v47  ;;  %v277_v33 = vrot.slane %v2483_v4, 4  ;;  %v640_v34 = vshrl.u32 %v2474_v1, 16 }
  0xb2   : > { %v821_v32 = vmax.bf16 %v789_v53, %v190_v56  ;;  %v822_v18 = vmax.bf16 %v790_v21, %v2465_v22  ;;  %v1222_v14 = vsel %vm1964_vm2, %v1217_v3, %v1221_v9  ;;  %v340_v37 = vmax.bf16 %v276_v11, %v2474_v1  ;;  %v2529_v53 = vld [vmem:[%s1940_s22 + $0x278] sm:$0xff] }
  0xb3   : > { %v1396_v39 = vmax.bf16 %v1222_v14, %v948_v27  ;;  %v1465_v40 = vmax.bf16 %v1427_v8, %v274_v58  ;;  %v341_v41 = vmax.bf16 %v277_v33, %v2483_v4  ;;  %v642_v44 = vrot.slane %v640_v34, 4  ;;  %v2507_v27 = vld [vmem:[%s1940_s22 + $0x260] sm:$0xff] }
  0xb4   : > { %v949_v46 = vmax.bf16 %v885_v55, %v821_v32  ;;  %v950_v56 = vmax.bf16 %v886_v16, %v822_v18  ;;  %v643_v48 = vshll.u32 %v2474_v1, 16  ;;  %v649_v57 = vshll.u32 %v2483_v4, 16 }
  0xb5   : > { %v1428_v15 = vmax.bf16 %v1396_v39, %v2439_v52  ;;  %v1523_v42 = vmax.bf16 %v1465_v40, %v628_v2  ;;  %v653_v47 = vshrl.u32 %v2483_v4, 16  ;;  %v659_v58 = vshll.u32 %v195_v35, 16  ;;  %v201_v39 = vld [vmem:[%s1940_s22 + $0x280] sm:$0x11] }
  0xb6   : > { %v645_v6 = vrot.slane %v643_v48, 5  ;;  %v651_v38 = vrot.slane %v649_v57, 5  ;;  %v887_v28 = vrot.slane %v196_v36, 4  ;;  %v888_v55 = vrot.slane %v2507_v27, 4 }
  0xb7   : > { %v1466_v60 = vmax.bf16 %v1428_v15, %v275_v25  ;;  %v655_v16 = vrot.slane %v653_v47, 4  ;;  %v661_v19 = vrot.slane %v659_v58, 5  ;;  %v1230_v50 = vor.u32 %v1229_v10, %v1226_v29 }
  0xb8   : > { %v646_v7 = vor.u32 %v645_v6, %v642_v44  ;;  %v1233_v12 = vshll.u32 %v2465_v22, 16  ;;  %v1243_v43 = vshll.u32 %v192_v54, 16  ;;  %v1248_v59 = vshrl.u32 %v196_v36, 16  ;;  %v202_v54 = vld [vmem:[%s1940_s22 + $0x288] sm:$0xff] }
  0xb9   : > { %v1524_v0 = vmax.bf16 %v1466_v60, %v638_v45  ;;  %v656_v30 = vor.u32 %v655_v16, %v651_v38  ;;  %v1231_v49 = vrot.slane %v1230_v50, 4  ;;  %v1251_v61 = vshll.u32 %v196_v36, 16  ;;  %v2553_v60 = vld [vmem:[%s1940_s22 + $0x290] sm:$0xff] }
  0xba   : > { %v647_v24 = vrot.slane %v646_v7, 4  ;;  %v1235_v62 = vrot.slane %v1233_v12, 5  ;;  %v1245_v63 = vrot.slane %v1243_v43, 5  ;;  %v1250_v52 = vrot.slane %v1248_v59, 4 }
  0xbb   : > { %v1757_v25 = vcombine.low %v1523_v42, %v1524_v0  ;;  %v657_v5 = vrot.slane %v656_v30, 4  ;;  %v1253_v9 = vrot.slane %v1251_v61, 5  ;;  %v1261_v29 = vshrl.u32 %v2507_v27, 16  ;;  %v198_v42 = vld [vmem:[%s1940_s22 + $0x268] sm:$0x11] }
  0xbc   : > { %v652_v22 = vsel %vm1964_vm2, %v647_v24, %v651_v38  ;;  %v1236_v23 = vsel %vm1964_vm2, %v1231_v49, %v1235_v62  ;;  %v1240_v51 = vor.u32 %v1239_v20, %v1235_v62  ;;  %v278_v10 = vrot.slane %v2516_v17, 4 }
  0xbd   : > { %1758 = vst [vmem:[%s2054_s25 + $0x50] sm:$0xff] %v1757_v25   ;;  %v662_v2 = vsel %vm1964_vm2, %v657_v5, %v661_v19  ;;  %v791_v45 = vmax.bf16 %v652_v22, %v340_v37  ;;  %v2526_v31 = vrot.slane %v1261_v29, 4  ;;  %v1397_v13 = vmax.bf16 %v1236_v23, %v949_v46  ;;  %v2569_v29 = vld [vmem:[%s1940_s22 + $0x2a0] sm:$0xff] }
  0xbe   : > { %v792_v21 = vmax.bf16 %v662_v2, %v341_v41  ;;  %v1241_v3 = vrot.slane %v1240_v51, 4  ;;  %v279_v8 = vrot.slane %v2529_v53, 4  ;;  %v342_v20 = vmax.bf16 %v278_v10, %v2516_v17 }
  0xbf   : > { %v823_v34 = vmax.bf16 %v791_v45, %v196_v36  ;;  %v1429_v32 = vmax.bf16 %v1397_v13, %v2474_v1  ;;  %v664_v18 = vshrl.u32 %v2516_v17, 16  ;;  %v667_v14 = vshll.u32 %v2516_v17, 16 }
  0xc0   : > { %v824_v35 = vmax.bf16 %v792_v21, %v2507_v27  ;;  %v1246_v37 = vsel %vm1964_vm2, %v1241_v3, %v1245_v63  ;;  %v343_v40 = vmax.bf16 %v279_v8, %v2529_v53  ;;  %v673_v41 = vshll.u32 %v2529_v53, 16  ;;  %v2577_v3 = vld [vmem:[%s1940_s22 + $0x2a8] sm:$0xff] }
  0xc1   : > { %v951_v44 = vmax.bf16 %v887_v28, %v823_v34  ;;  %v1398_v46 = vmax.bf16 %v1246_v37, %v950_v56  ;;  %v1467_v48 = vmax.bf16 %v1429_v32, %v276_v11  ;;  %v666_v57 = vrot.slane %v664_v18, 4 }
  0xc2   : > { %v952_v15 = vmax.bf16 %v888_v55, %v824_v35  ;;  %v669_v36 = vrot.slane %v667_v14, 5  ;;  %v675_v47 = vrot.slane %v673_v41, 5  ;;  %v677_v58 = vshrl.u32 %v2529_v53, 16 }
  0xc3   : > { %v1430_v6 = vmax.bf16 %v1398_v46, %v2483_v4  ;;  %v1525_v38 = vmax.bf16 %v1467_v48, %v652_v22  ;;  %v683_v16 = vshll.u32 %v201_v39, 16  ;;  %v889_v19 = vrot.slane %v202_v54, 4  ;;  %v207_v39 = vld [vmem:[%s1940_s22 + $0x2b0] sm:$0x11] }
  0xc4   : > { %v670_v28 = vor.u32 %v669_v36, %v666_v57  ;;  %v679_v56 = vrot.slane %v677_v58, 4  ;;  %v890_v1 = vrot.slane %v2553_v60, 4  ;;  %v1254_v11 = vor.u32 %v1253_v9, %v1250_v52 }
  0xc5   : > { %v1468_v55 = vmax.bf16 %v1430_v6, %v277_v33  ;;  %v685_v50 = vrot.slane %v683_v16, 5  ;;  %v1257_v7 = vshll.u32 %v2507_v27, 16  ;;  %v1267_v12 = vshll.u32 %v198_v42, 16  ;;  %v208_v42 = vld [vmem:[%s1940_s22 + $0x2b8] sm:$0xff] }
  0xc6   : > { %v671_v43 = vrot.slane %v670_v28, 4  ;;  %v680_v59 = vor.u32 %v679_v56, %v675_v47  ;;  %v1255_v0 = vrot.slane %v1254_v11, 4  ;;  %v1272_v30 = vshrl.u32 %v202_v54, 16 }
  0xc7   : > { %v1526_v49 = vmax.bf16 %v1468_v55, %v662_v2  ;;  %v1259_v61 = vrot.slane %v1257_v7, 5  ;;  %v1269_v24 = vrot.slane %v1267_v12, 5  ;;  %v1275_v62 = vshll.u32 %v202_v54, 16 }
  0xc8   : > { %v2561_v63 = vsel %vm1964_vm2, %v671_v43, %v675_v47  ;;  %v681_v4 = vrot.slane %v680_v59, 4  ;;  %v1274_v33 = vrot.slane %v1272_v30, 4  ;;  %v1285_v27 = vshrl.u32 %v2553_v60, 16 }
  0xc9   : > { %v1759_v52 = vcombine.low %v1525_v38, %v1526_v49  ;;  %v793_v25 = vmax.bf16 %v2561_v63, %v342_v20  ;;  %v1260_v5 = vsel %vm1964_vm2, %v1255_v0, %v1259_v61  ;;  %v1264_v9 = vor.u32 %v2526_v31, %v1259_v61  ;;  %v2603_v38 = vld [vmem:[%s1940_s22 + $0x2c0] sm:$0xff] }
  0xca   : > { %v686_v22 = vsel %vm1964_vm2, %v681_v4, %v685_v50  ;;  %v1277_v23 = vrot.slane %v1275_v62, 5  ;;  %v2573_v51 = vrot.slane %v1285_v27, 4  ;;  %v1399_v2 = vmax.bf16 %v1260_v5, %v951_v44  ;;  %v2618_v27 = vld [vmem:[%s1940_s22 + $0x2d0] sm:$0xff] }
  0xcb   : > { %1760 = vst [vmem:[%s2054_s25 + $0x58] sm:$0xff] %v1759_v52   ;;  %v794_v45 = vmax.bf16 %v686_v22, %v343_v40  ;;  %v825_v13 = vmax.bf16 %v793_v25, %v202_v54  ;;  %v1265_v21 = vrot.slane %v1264_v9, 4  ;;  %v280_v20 = vrot.slane %v2569_v29, 4 }
  0xcc   : > { %v1431_v31 = vmax.bf16 %v1399_v2, %v2516_v17  ;;  %v281_v34 = vrot.slane %v2577_v3, 4  ;;  %v688_v32 = vshrl.u32 %v2569_v29, 16  ;;  %v691_v18 = vshll.u32 %v2569_v29, 16 }
  0xcd   : > { %v826_v14 = vmax.bf16 %v794_v45, %v2553_v60  ;;  %v953_v35 = vmax.bf16 %v889_v19, %v825_v13  ;;  %v1270_v37 = vsel %vm1964_vm2, %v1265_v21, %v1269_v24  ;;  %v344_v40 = vmax.bf16 %v280_v20, %v2569_v29  ;;  %v2625_v45 = vld [vmem:[%s1940_s22 + $0x2d8] sm:$0xff] }
  0xce   : > { %v1400_v41 = vmax.bf16 %v1270_v37, %v952_v15  ;;  %v1469_v44 = vmax.bf16 %v1431_v31, %v278_v10  ;;  %v345_v46 = vmax.bf16 %v281_v34, %v2577_v3  ;;  %v690_v48 = vrot.slane %v688_v32, 4  ;;  %v204_v15 = vld [vmem:[%s1940_s22 + $0x298] sm:$0x11]  ;;  %v213_v37 = vld [vmem:[%s1940_s22 + $0x2e0] sm:$0x11] }
  0xcf   : > { %v954_v57 = vmax.bf16 %v890_v1, %v826_v14  ;;  %v693_v54 = vrot.slane %v691_v18, 5  ;;  %v697_v36 = vshll.u32 %v2577_v3, 16  ;;  %v701_v47 = vshrl.u32 %v2577_v3, 16 }
  0xd0   : > { %v1432_v58 = vmax.bf16 %v1400_v41, %v2529_v53  ;;  %v1527_v6 = vmax.bf16 %v1469_v44, %v2561_v63  ;;  %v707_v17 = vshll.u32 %v207_v39, 16  ;;  %v891_v10 = vrot.slane %v208_v42, 4 }
  0xd1   : > { %v694_v16 = vor.u32 %v693_v54, %v690_v48  ;;  %v699_v19 = vrot.slane %v697_v36, 5  ;;  %v703_v28 = vrot.slane %v701_v47, 4  ;;  %v892_v56 = vrot.slane %v2603_v38, 4 }
  0xd2   : > { %v1470_v1 = vmax.bf16 %v1432_v58, %v279_v8  ;;  %v709_v11 = vrot.slane %v707_v17, 5  ;;  %v1278_v55 = vor.u32 %v1277_v23, %v1274_v33  ;;  %v1281_v50 = vshll.u32 %v2553_v60, 16 }
  0xd3   : > { %v695_v7 = vrot.slane %v694_v16, 4  ;;  %v704_v12 = vor.u32 %v703_v28, %v699_v19  ;;  %v1291_v43 = vshll.u32 %v204_v15, 16  ;;  %v1296_v59 = vshrl.u32 %v208_v42, 16 }
  0xd4   : > { %v1528_v0 = vmax.bf16 %v1470_v1, %v686_v22  ;;  %v1279_v30 = vrot.slane %v1278_v55, 4  ;;  %v1283_v49 = vrot.slane %v1281_v50, 5  ;;  %v1299_v61 = vshll.u32 %v208_v42, 16 }
  0xd5   : > { %v2611_v24 = vsel %vm1964_vm2, %v695_v7, %v699_v19  ;;  %v705_v53 = vrot.slane %v704_v12, 4  ;;  %v1293_v8 = vrot.slane %v1291_v43, 5  ;;  %v1298_v62 = vrot.slane %v1296_v59, 4 }
  0xd6   : > { %v1761_v63 = vcombine.low %v1527_v6, %v1528_v0  ;;  %v795_v60 = vmax.bf16 %v2611_v24, %v344_v40  ;;  %v1284_v4 = vsel %vm1964_vm2, %v1279_v30, %v1283_v49  ;;  %v1288_v33 = vor.u32 %v2573_v51, %v1283_v49  ;;  %v210_v6 = vld [vmem:[%s1940_s22 + $0x2c8] sm:$0x11] }
  0xd7   : > { %v710_v52 = vsel %vm1964_vm2, %v705_v53, %v709_v11  ;;  %v1301_v25 = vrot.slane %v1299_v61, 5  ;;  %v1309_v5 = vshrl.u32 %v2603_v38, 16  ;;  %v1401_v9 = vmax.bf16 %v1284_v4, %v953_v35 }
  0xd8   : > { %1762 = vst [vmem:[%s2054_s25 + $0x60] sm:$0xff] %v1761_v63   ;;  %v796_v22 = vmax.bf16 %v710_v52, %v345_v46  ;;  %v827_v23 = vmax.bf16 %v795_v60, %v208_v42  ;;  %v1289_v2 = vrot.slane %v1288_v33, 4  ;;  %v282_v13 = vrot.slane %v2618_v27, 4  ;;  %v214_v42 = vld [vmem:[%s1940_s22 + $0x2e8] sm:$0xff] }
  0xd9   : > { %v1311_v51 = vrot.slane %v1309_v5, 4  ;;  %v1433_v21 = vmax.bf16 %v1401_v9, %v2569_v29  ;;  %v283_v31 = vrot.slane %v2625_v45, 4  ;;  %v712_v32 = vshrl.u32 %v2618_v27, 16  ;;  %v215_v29 = vld [vmem:[%s1940_s22 + $0x2f0] sm:$0xff] }
  0xda   : > { %v828_v18 = vmax.bf16 %v796_v22, %v2603_v38  ;;  %v955_v14 = vmax.bf16 %v891_v10, %v827_v23  ;;  %v1294_v35 = vsel %vm1964_vm2, %v1289_v2, %v1293_v8  ;;  %v346_v39 = vmax.bf16 %v282_v13, %v2618_v27 }
  0xdb   : > { %v1402_v40 = vmax.bf16 %v1294_v35, %v954_v57  ;;  %v1471_v41 = vmax.bf16 %v1433_v21, %v280_v20  ;;  %v347_v44 = vmax.bf16 %v283_v31, %v2625_v45  ;;  %v714_v46 = vrot.slane %v712_v32, 4 }
  0xdc   : > { %v956_v48 = vmax.bf16 %v892_v56, %v828_v18  ;;  %v715_v54 = vshll.u32 %v2618_v27, 16  ;;  %v721_v36 = vshll.u32 %v2625_v45, 16  ;;  %v725_v47 = vshrl.u32 %v2625_v45, 16 }
  0xdd   : > { %v1434_v58 = vmax.bf16 %v1402_v40, %v2577_v3  ;;  %v1529_v57 = vmax.bf16 %v1471_v41, %v2611_v24  ;;  %v731_v20 = vshll.u32 %v213_v37, 16  ;;  %v893_v15 = vrot.slane %v214_v42, 4  ;;  %v218_v40 = vld [vmem:[%s1940_s22 + $0x308] sm:$0xff] }
  0xde   : > { %v717_v17 = vrot.slane %v715_v54, 5  ;;  %v723_v10 = vrot.slane %v721_v36, 5  ;;  %v727_v16 = vrot.slane %v725_v47, 4  ;;  %v894_v19 = vrot.slane %v215_v29, 4  ;;  %v219_v54 = vld [vmem:[%s1940_s22 + $0x310] sm:$0x11] }
  0xdf   : > { %v1472_v28 = vmax.bf16 %v1434_v58, %v281_v34  ;;  %v733_v56 = vrot.slane %v731_v20, 5  ;;  %v1302_v1 = vor.u32 %v1301_v25, %v1298_v62  ;;  %v1305_v11 = vshll.u32 %v2603_v38, 16  ;;  %v216_v62 = vld [vmem:[%s1940_s22 + $0x2f8] sm:$0x11] }
  0xe0   : > { %v718_v55 = vor.u32 %v717_v17, %v714_v46  ;;  %v728_v50 = vor.u32 %v727_v16, %v723_v10  ;;  %v1315_v7 = vshll.u32 %v210_v6, 16  ;;  %v1320_v12 = vshrl.u32 %v214_v42, 16 }
  0xe1   : > { %v1530_v43 = vmax.bf16 %v1472_v28, %v710_v52  ;;  %v1303_v59 = vrot.slane %v1302_v1, 4  ;;  %v1307_v0 = vrot.slane %v1305_v11, 5  ;;  %v1323_v30 = vshll.u32 %v214_v42, 16 }
  0xe2   : > { %v719_v49 = vrot.slane %v718_v55, 4  ;;  %v729_v61 = vrot.slane %v728_v50, 4  ;;  %v1317_v24 = vrot.slane %v1315_v7, 5  ;;  %v1322_v53 = vrot.slane %v1320_v12, 4 }
  0xe3   : > { %v1763_v3 = vcombine.low %v1529_v57, %v1530_v43  ;;  %v1308_v34 = vsel %vm1964_vm2, %v1303_v59, %v1307_v0  ;;  %v1312_v8 = vor.u32 %v1311_v51, %v1307_v0  ;;  %v1325_v38 = vrot.slane %v1323_v30, 5 }
  0xe4   : > { %v724_v63 = vsel %vm1964_vm2, %v719_v49, %v723_v10  ;;  %v734_v60 = vsel %vm1964_vm2, %v729_v61, %v733_v56  ;;  %v1333_v4 = vshrl.u32 %v215_v29, 16  ;;  %v1403_v33 = vmax.bf16 %v1308_v34, %v955_v14 }
  0xe5   : > { %1764 = vst [vmem:[%s2054_s25 + $0x68] sm:$0xff] %v1763_v3   ;;  %v797_v52 = vmax.bf16 %v724_v63, %v346_v39  ;;  %v798_v25 = vmax.bf16 %v734_v60, %v347_v44  ;;  %v1313_v5 = vrot.slane %v1312_v8, 4  ;;  %v1326_v9 = vor.u32 %v1325_v38, %v1322_v53  ;;  %v217_v39 = vld [vmem:[%s1940_s22 + $0x300] sm:$0xff] }
  0xe6   : > { %v1335_v22 = vrot.slane %v1333_v4, 4  ;;  %v1435_v23 = vmax.bf16 %v1403_v33, %v2618_v27  ;;  %v1329_v2 = vshll.u32 %v215_v29, 16  ;;  %v1339_v51 = vshll.u32 %v216_v62, 16 }
  0xe7   : > { %v829_v21 = vmax.bf16 %v797_v52, %v214_v42  ;;  %v830_v32 = vmax.bf16 %v798_v25, %v215_v29  ;;  %v1318_v18 = vsel %vm1964_vm2, %v1313_v5, %v1317_v24  ;;  %v1327_v35 = vrot.slane %v1326_v9, 4 }
  0xe8   : > { %v1404_v14 = vmax.bf16 %v1318_v18, %v956_v48  ;;  %v1473_v37 = vmax.bf16 %v1435_v23, %v282_v13  ;;  %v1331_v41 = vrot.slane %v1329_v2, 5  ;;  %v1341_v36 = vrot.slane %v1339_v51, 5 }
  0xe9   : > { %v957_v44 = vmax.bf16 %v893_v15, %v829_v21  ;;  %v958_v46 = vmax.bf16 %v894_v19, %v830_v32  ;;  %v1441_v47 = vrot.slane %v217_v39, 4  ;;  %v1478_v48 = vshrl.u32 %v217_v39, 16 }
  0xea   : > { %v1436_v58 = vmax.bf16 %v1404_v14, %v2625_v45  ;;  %v1531_v42 = vmax.bf16 %v1473_v37, %v724_v63  ;;  %v1332_v57 = vsel %vm1964_vm2, %v1327_v35, %v1331_v41  ;;  %v1336_v6 = vor.u32 %v1335_v22, %v1331_v41 }
  0xeb   : > { %v1405_v29 = vmax.bf16 %v1332_v57, %v957_v44  ;;  %v1481_v20 = vshll.u32 %v217_v39, 16  ;;  %v1487_v27 = vshll.u32 %v218_v40, 16  ;;  %v1491_v15 = vshrl.u32 %v218_v40, 16 }
  0xec   : > { %v1474_v13 = vmax.bf16 %v1436_v58, %v283_v31  ;;  %v1337_v17 = vrot.slane %v1336_v6, 4  ;;  %v1497_v10 = vshll.u32 %v219_v54, 16  ;;  %v1480_v19 = vrot.slane %v1478_v48, 4 }
  0xed   : > { %v1437_v16 = vmax.bf16 %v1405_v29, %v217_v39  ;;  %v1483_v28 = vrot.slane %v1481_v20, 5  ;;  %v1489_v56 = vrot.slane %v1487_v27, 5  ;;  %v1493_v55 = vrot.slane %v1491_v15, 4 }
  0xee   : > { %v1532_v1 = vmax.bf16 %v1474_v13, %v734_v60  ;;  %v1342_v11 = vsel %vm1964_vm2, %v1337_v17, %v1341_v36  ;;  %v1442_v7 = vrot.slane %v218_v40, 4  ;;  %v1499_v59 = vrot.slane %v1497_v10, 5 }
  0xef   : > { %v1406_v50 = vmax.bf16 %v1342_v11, %v958_v46  ;;  %v1484_v12 = vor.u32 %v1483_v28, %v1480_v19  ;;  %v1475_v31 = vmax.bf16 %v1441_v47, %v1437_v16  ;;  %v1494_v43 = vor.u32 %v1493_v55, %v1489_v56 }
  0xf0   : > { %v1765_v45 = vcombine.low %v1531_v42, %v1532_v1 }
  0xf1   : > { %v1438_v0 = vmax.bf16 %v1406_v50, %v218_v40  ;;  %v1485_v30 = vrot.slane %v1484_v12, 4  ;;  %v1495_v49 = vrot.slane %v1494_v43, 4 }
  0xf2   : > { %1766 = vst [vmem:[%s2054_s25 + $0x70] sm:$0xff] %v1765_v45  }
  0xf3   : > { %v1476_v61 = vmax.bf16 %v1442_v7, %v1438_v0  ;;  %v1490_v24 = vsel %vm1964_vm2, %v1485_v30, %v1489_v56  ;;  %v1500_v53 = vsel %vm1964_vm2, %v1495_v49, %v1499_v59 }
  0xf4   : > { %v1533_v3 = vmax.bf16 %v1490_v24, %v1475_v31 }
  0xf5   : > { %v1534_v34 = vmax.bf16 %v1500_v53, %v1476_v61 }
  0xf7   : > { %v1767_v8 = vcombine.low %v1533_v3, %v1534_v34 }
  0xf9   : > { %1768 = vst [vmem:[%s2054_s25 + $0x78] sm:$0xff] %v1767_v8  }
  0xfa   : > { %1824 = shalt.err (!%p1821_p3)
}
  0xfb   : > { %s1825_s11 = scalar_lea.hbm %s2687_s30, 2048  ;;  %s1829_s18 = scalar_lea.hbm %s2736_s1, 4096 }
  0xfc   : > { %p1826_p4 = scmp.ne.s32.totalorder %s2687_s30, %s1825_s11  ;;  %p1830_p9 = scmp.lt.u32.totalorder %s2687_s30, %s2736_s1 }
  0xfd   : > { %p1831_p10 = scmp.lt.u32.totalorder %s1829_s18, %s1825_s11  ;;  %p1833_p12 = scmp.lt.u32.totalorder %s1825_s11, %s2687_s30 }
  0xfe   : > { %p1827_p7 = pnand %p1826_p4, %p1926_p5 }
  0xff   : > { %p1832_p11 = por %p1831_p10, %p1830_p9 }
 0x100   : > { %p1828_p8 = pneg %p1827_p7 }
 0x101   : > { %p1834_p13 = por %p1833_p12, %p1832_p11 }
 0x103   : > { %p1835_p0 = pnand %p1834_p13, %p1828_p8 }
 0x105   : > { %1838 = shalt.err (!%p1835_p0)
}
 0x106   : > { %s1876_s21 = smov 64   ;;  %s1877_s22 = smov 4  }
 0x107   : > { %1770 = dma.vmem_to_hbm [thread:$0]  (%p1926_p5), %s2689_s27, 2048, %s2687_s30, %s2694_s2, %s1876_s21, %s1876_s21, %s1877_s22  }
 0x108 PF: > { %p1776_p1 = scmp.ge.s32.totalorder %s1873_s9, 2  ;;  %s1597_s23 = sand.u32 1, %s1861_s6  }
 0x109   : > { %s1598_s24 = scalar_lea.sflag [#allocation3], %s1597_s23 }
 0x10a   : > { %p1773_p2 = pnand %p1776_p1, %p1930_p6 }
 0x10c   : > { %1856 = dma.done.wait (!%p1773_p2), %s1598_s24, 2048  }
 0x10d   : > { %1858 = vsyncadd (!%p1773_p2), %s1598_s24, 4294965248  ;;  %p11_p3 = scmp.ge.s32.totalorder %s1913_s12, 4   ;;  %s2741_s6 = smov %s1865_s7 }
 0x10e   : > { %s2742_s7 = smov %s1869_s8  ;;  %s2743_s8 = smov %s1924_s15 }
 0x10f   : > { %s2744_s9 = smov %s1913_s12  ;;  %13 = sbr.rel (!%p11_p3) target bundleno = 3 (0x3), region = 59 }
 0x116   :  { %1603 = vsyncpa [#allocation3], 1 }
 0x117   :  { %1605 = vsyncpa [#allocation3 + $0x1], 1 }

</bundles_post_ra>
